<compile_context>
chip_gen: v6e
topology: v6e:2x2x1
jax: 0.10.0
libtpu: 0.0.40
codegen_flags: <defaults>
</compile_context>

<pallas_src>
import functools

import jax
import jax.numpy as jnp
from jax import lax
from jax.experimental import pallas as pl
from jax.experimental.pallas import tpu as pltpu


# ----------------------------------------------------------------------------
# Fused Bottleneck kernel (one grid step == one batch image, all in VMEM)
# ----------------------------------------------------------------------------
def _bottleneck_kernel(*refs, H, W, cin, cb, cout, stride, dilation,
                       fuse_residual):
    if fuse_residual:
        (x_ref, w1_ref, w2_ref, w3_ref, s12_ref, s3_ref,
         o_ref, t1p_ref) = refs
        res_ref = None
    else:
        (x_ref, w1_ref, w2_ref, w3_ref, s12_ref, s3_ref, res_ref,
         o_ref, t1p_ref) = refs

    pad = dilation
    Ho = (H - 1) // stride + 1
    Wo = (W - 1) // stride + 1
    f32, bf16 = jnp.float32, jnp.bfloat16

    # ---- conv1 (1x1) + bn1 (scale folded into weights) + relu --------------
    x = x_ref[...]                                        # (H*W, cin) bf16
    t1 = jnp.dot(x, w1_ref[...], preferred_element_type=f32)
    t1 = jnp.maximum(t1 + s12_ref[0:1, :], 0.0)           # (H*W, cb) f32

    # ---- conv2 (3x3, dilated, padding=dilation) + bn2 + relu ---------------
    # Zero-padded copy of the conv1 output kept entirely in VMEM; the 3x3 conv
    # is 9 accumulating MXU dots over shifted windows (no HBM im2col, no
    # intermediate HBM round trip).  The halo is re-zeroed every step so the
    # kernel stays correct when the "parallel" batch axis is core-sharded.
    t1p_ref[...] = jnp.zeros(t1p_ref.shape, f32)
    t1p_ref[pad:pad + H, pad:pad + W, :] = t1.reshape(H, W, cb)

    w2 = w2_ref[...]                                      # (9, cb, cb) bf16
    # bn2 shift seeds the accumulator (broadcast hoisted out of the tap loop).
    acc = jnp.broadcast_to(s12_ref[1:2, :], (H * W, cb))
    for kh in range(3):
        for kw in range(3):
            win = t1p_ref[kh * dilation:kh * dilation + H,
                          kw * dilation:kw * dilation + W, :]
            acc = acc + jnp.dot(win.reshape(H * W, cb).astype(bf16),
                                w2[kh * 3 + kw],
                                preferred_element_type=f32)
    if stride > 1:
        # TODO(synk): stride>1 computes the stride-1 conv then subsamples
        # (exact, but wasteful for large strides / feature maps).
        acc = acc.reshape(H, W, cb)[::stride, ::stride, :].reshape(Ho * Wo, cb)
    t2 = jnp.maximum(acc, 0.0)                            # (Ho*Wo, cb) f32

    # ---- conv3 (1x1) + bn3 + residual + relu --------------------------------
    out = jnp.dot(t2.astype(bf16), w3_ref[...], preferred_element_type=f32)
    out = out + s3_ref[...]
    if fuse_residual:
        res = x.astype(f32)        # residual == input (cin == cout, stride 1)
    else:
        res = res_ref[...].astype(f32)
    # TODO(synk): at cout=8 the final store uses 8/128 lanes; for production
    # DLA channel counts (>=128) this store is naturally lane-dense.
    o_ref[...] = jnp.maximum(out + res, 0.0).astype(o_ref.dtype)


# ----------------------------------------------------------------------------
# Wrapper
# ----------------------------------------------------------------------------
def bottleneck_forward(params, x_nhwc, residual=None):
    """Bottleneck forward. x_nhwc: (N,H,W,Cin) f32; residual optional NHWC."""
    N, H, W, cin = x_nhwc.shape
    assert cin == params["inplanes"]
    cb, cout = params["bottle"], params["planes"]
    stride, dil = params["stride"], params["dilation"]
    Ho = (H - 1) // stride + 1
    Wo = (W - 1) // stride + 1

    fuse_res = residual is None
    if fuse_res:
        # Mirrors PyTorch: `out += x` needs matching shapes.
        assert stride == 1 and cin == cout, (
            "identity residual (residual=None) needs cin == planes, stride==1")

    x3 = x_nhwc.reshape(N, H * W, cin).astype(jnp.bfloat16)

    inputs = [x3, params["w1f"], params["w2f"], params["w3f"],
              params["s12"], params["s3"]]
    in_specs = [
        pl.BlockSpec((None, H * W, cin), lambda n: (n, 0, 0)),
        pl.BlockSpec((cin, cb), lambda n: (0, 0)),
        pl.BlockSpec((9, cb, cb), lambda n: (0, 0, 0)),
        pl.BlockSpec((cb, cout), lambda n: (0, 0)),
        pl.BlockSpec((2, cb), lambda n: (0, 0)),
        pl.BlockSpec((1, cout), lambda n: (0, 0)),
    ]
    if not fuse_res:
        assert residual.shape == (N, Ho, Wo, cout)
        inputs.append(residual.reshape(N, Ho * Wo, cout).astype(jnp.bfloat16))
        in_specs.append(
            pl.BlockSpec((None, Ho * Wo, cout), lambda n: (n, 0, 0)))

    kernel = functools.partial(
        _bottleneck_kernel, H=H, W=W, cin=cin, cb=cb, cout=cout,
        stride=stride, dilation=dil, fuse_residual=fuse_res)

    out3 = pl.pallas_call(
        kernel,
        out_shape=jax.ShapeDtypeStruct((N, Ho * Wo, cout), jnp.float32),
        grid=(N,),
        in_specs=in_specs,
        out_specs=pl.BlockSpec((None, Ho * Wo, cout), lambda n: (n, 0, 0)),
        scratch_shapes=[pltpu.VMEM((H + 2 * dil, W + 2 * dil, cb),
                                   jnp.float32)],
        compiler_params=pltpu.CompilerParams(
            dimension_semantics=("parallel",)),
    )(*inputs)
    return out3.reshape(N, Ho, Wo, cout)


# ----------------------------------------------------------------------------
# Parameters (deterministic synthetic, mirroring Bottleneck.__init__)
# ----------------------------------------------------------------------------
def _fold_bn(key, c, eps=1e-5):
    """Inference-mode BatchNorm folded into (scale, shift), synthetic stats."""
    k1, k2, k3, k4 = jax.random.split(key, 4)
    gamma = 1.0 + 0.1 * jax.random.normal(k1, (c,), jnp.float32)
    beta = 0.1 * jax.random.normal(k2, (c,), jnp.float32)
    mean = 0.1 * jax.random.normal(k3, (c,), jnp.float32)
    var = 0.5 + jnp.abs(jax.random.normal(k4, (c,), jnp.float32))
    scale = gamma * lax.rsqrt(var + eps)
    shift = beta - mean * scale
    return scale, shift


def make_bottleneck_params(key, inplanes, planes, stride=1, dilation=1):
    bottle = planes // 2                           # Bottleneck.expansion == 2
    k = jax.random.split(key, 6)
    # PyTorch OIHW conv weights.
    w1 = 0.1 * jax.random.normal(k[0], (bottle, inplanes, 1, 1), jnp.float32)
    w2 = 0.1 * jax.random.normal(k[1], (bottle, bottle, 3, 3), jnp.float32)
    w3 = 0.1 * jax.random.normal(k[2], (planes, bottle, 1, 1), jnp.float32)
    sc1, sh1 = _fold_bn(k[3], bottle)
    sc2, sh2 = _fold_bn(k[4], bottle)
    sc3, sh3 = _fold_bn(k[5], planes)
    # Fold the BN scale into the weights (output-channel axis); cast to bf16.
    w1f = (w1[:, :, 0, 0] * sc1[:, None]).T.astype(jnp.bfloat16)   # (cin, cb)
    w2f = (jnp.transpose(w2, (2, 3, 1, 0)) * sc2).reshape(
        9, bottle, bottle).astype(jnp.bfloat16)                    # (9, cb, cb)
    w3f = (w3[:, :, 0, 0] * sc3[:, None]).T.astype(jnp.bfloat16)   # (cb, cout)
    return dict(inplanes=inplanes, planes=planes, bottle=bottle,
                stride=stride, dilation=dilation,
                w1f=w1f, w2f=w2f, w3f=w3f,
                s12=jnp.stack([sh1, sh2], axis=0),                 # (2, cb)
                s3=sh3.reshape(1, planes))                         # (1, cout)


# ----------------------------------------------------------------------------
# Pure-JAX reference (lax.conv) with identical bf16 quantization points
# ----------------------------------------------------------------------------
def bottleneck_ref(params, x_nhwc, residual=None):
    if residual is None:
        residual = x_nhwc
    cin, cb, cout = params["inplanes"], params["bottle"], params["planes"]
    s, d = params["stride"], params["dilation"]
    dn = ("NHWC", "HWIO", "NHWC")
    f32, bf16 = jnp.float32, jnp.bfloat16
    s1 = params["s12"][0].reshape(1, 1, 1, cb)
    s2 = params["s12"][1].reshape(1, 1, 1, cb)
    s3 = params["s3"].reshape(1, 1, 1, cout)

    t = lax.conv_general_dilated(
        x_nhwc.astype(bf16), params["w1f"].reshape(1, 1, cin, cb), (1, 1),
        "VALID", dimension_numbers=dn, preferred_element_type=f32)
    t = jnp.maximum(t + s1, 0.0).astype(bf16)
    t = lax.conv_general_dilated(
        t, params["w2f"].reshape(3, 3, cb, cb), (s, s), [(d, d), (d, d)],
        rhs_dilation=(d, d), dimension_numbers=dn, preferred_element_type=f32)
    t = jnp.maximum(t + s2, 0.0).astype(bf16)
    t = lax.conv_general_dilated(
        t, params["w3f"].reshape(1, 1, cb, cout), (1, 1), "VALID",
        dimension_numbers=dn, preferred_element_type=f32)
    out = t + s3 + residual.astype(bf16).astype(f32)
    return jnp.maximum(out, 0.0)


# ----------------------------------------------------------------------------
if __name__ == "__main__":
    root = jax.random.PRNGKey(0)
    kx1, kx2, kres, kp1, kp2 = jax.random.split(root, 5)

    # Config A: the module's default path (residual = x), so inplanes==planes.
    # Also exercises dilation=2 (padding follows dilation, as in the module).
    pA = make_bottleneck_params(kp1, inplanes=8, planes=8, stride=1, dilation=2)
    xA_nchw = jax.random.normal(kx1, (2, 8, 16, 16), jnp.float32)
    xA = jnp.transpose(xA_nchw, (0, 2, 3, 1))             # NCHW -> NHWC
    outA = bottleneck_forward(pA, xA)

    # Config B: spec-sized input (2, 4, 16, 16) with an explicit residual
    # (forward(x, residual) signature), planes=8, dilation=1.
    pB = make_bottleneck_params(kp2, inplanes=4, planes=8, stride=1, dilation=1)
    xB_nchw = jax.random.normal(kx2, (2, 4, 16, 16), jnp.float32)
    xB = jnp.transpose(xB_nchw, (0, 2, 3, 1))
    resB_nchw = jax.random.normal(kres, (2, 8, 16, 16), jnp.float32)
    resB = jnp.transpose(resB_nchw, (0, 2, 3, 1))
    outB = bottleneck_forward(pB, xB, resB)

    outA, outB = jax.block_until_ready((outA, outB))

    for name, out, p, x, r in (("A", outA, pA, xA, None),
                               ("B", outB, pB, xB, resB)):
        ref = bottleneck_ref(p, x, r)
        err = float(jnp.max(jnp.abs(out - ref)))
        rel = err / (float(jnp.max(jnp.abs(ref))) + 1e-6)
        assert rel < 1e-2, f"config {name}: mismatch abs={err:.3e} rel={rel:.3e}"

    assert outA.shape == (2, 16, 16, 8)
    assert outB.shape == (2, 16, 16, 8)
    print("KERNEL_OK")
</pallas_src>

<mosaic_0001>
module attributes {stable_mosaic.version = 11 : i64} {
  func.func @_bottleneck_kernel(%arg0: i32, %arg1: memref<1x256x8xbf16, #tpu.memory_space<vmem>>, %arg2: memref<8x4xbf16, #tpu.memory_space<vmem>>, %arg3: memref<9x4x4xbf16, #tpu.memory_space<vmem>>, %arg4: memref<4x8xbf16, #tpu.memory_space<vmem>>, %arg5: memref<2x4xf32, #tpu.memory_space<vmem>>, %arg6: memref<1x8xf32, #tpu.memory_space<vmem>>, %arg7: memref<1x256x8xf32, #tpu.memory_space<vmem>>, %arg8: memref<20x20x4xf32, #tpu.memory_space<vmem>>) attributes {dimension_semantics = [#tpu.dimension_semantics<parallel>], iteration_bounds = array<i64: 2>, scalar_prefetch = 0 : i64, scratch_operands = 1 : i64, tpu.core_type = #tpu.core_type<tc>, window_params = [{transform_indices = @transform_0, window_bounds = array<i64: 1, 256, 8>}, {pipeline_mode = #tpu.pipeline_mode<synchronous>, transform_indices = @transform_1, window_bounds = array<i64: 8, 4>}, {pipeline_mode = #tpu.pipeline_mode<synchronous>, transform_indices = @transform_2, window_bounds = array<i64: 9, 4, 4>}, {pipeline_mode = #tpu.pipeline_mode<synchronous>, transform_indices = @transform_3, window_bounds = array<i64: 4, 8>}, {pipeline_mode = #tpu.pipeline_mode<synchronous>, transform_indices = @transform_4, window_bounds = array<i64: 2, 4>}, {pipeline_mode = #tpu.pipeline_mode<synchronous>, transform_indices = @transform_5, window_bounds = array<i64: 1, 8>}, {transform_indices = @transform_6, window_bounds = array<i64: 1, 256, 8>}]} {
    %c0 = arith.constant 0 : index
    %c0_0 = arith.constant 0 : index
    %c0_1 = arith.constant 0 : index
    %0 = vector.load %arg1[%c0, %c0_0, %c0_1] : memref<1x256x8xbf16, #tpu.memory_space<vmem>>, vector<1x256x8xbf16>
    %1 = vector.shape_cast %0 : vector<1x256x8xbf16> to vector<256x8xbf16>
    %c0_2 = arith.constant 0 : index
    %c0_3 = arith.constant 0 : index
    %2 = vector.load %arg2[%c0_2, %c0_3] : memref<8x4xbf16, #tpu.memory_space<vmem>>, vector<8x4xbf16>
    %cst = arith.constant dense<0.000000e+00> : vector<256x4xf32>
    %3 = tpu.matmul %1, %2, %cst {dimension_numbers = #tpu.dot_dimension_numbers<[1], [0], [0], [1], [0, 0, 1, 1], [], []>} : vector<256x8xbf16>, vector<8x4xbf16>, vector<256x4xf32> -> vector<256x4xf32>
    %c0_4 = arith.constant 0 : index
    %c0_5 = arith.constant 0 : index
    %4 = vector.load %arg5[%c0_4, %c0_5] : memref<2x4xf32, #tpu.memory_space<vmem>>, vector<1x4xf32>
    %5 = vector.broadcast %4 : vector<1x4xf32> to vector<256x4xf32>
    %6 = arith.addf %3, %5 : vector<256x4xf32>
    %cst_6 = arith.constant 0.000000e+00 : f32
    %7 = vector.broadcast %cst_6 : f32 to vector<256x4xf32>
    %8 = arith.maximumf %6, %7 : vector<256x4xf32>
    %cst_7 = arith.constant 0.000000e+00 : f32
    %9 = vector.broadcast %cst_7 : f32 to vector<20x20x4xf32>
    %c0_8 = arith.constant 0 : index
    %c0_9 = arith.constant 0 : index
    %c0_10 = arith.constant 0 : index
    %10 = vector.load %arg8[%c0_8, %c0_9, %c0_10] : memref<20x20x4xf32, #tpu.memory_space<vmem>>, vector<20x20x4xf32>
    tpu.vector_store %arg8[%c0_8, %c0_9, %c0_10], %9 {strides = array<i32>} : memref<20x20x4xf32, #tpu.memory_space<vmem>>, vector<20x20x4xf32>,
    %11 = vector.shape_cast %8 : vector<256x4xf32> to vector<16x16x4xf32>
    %c2 = arith.constant 2 : index
    %c2_11 = arith.constant 2 : index
    %c0_12 = arith.constant 0 : index
    %12 = vector.load %arg8[%c2, %c2_11, %c0_12] : memref<20x20x4xf32, #tpu.memory_space<vmem>>, vector<16x16x4xf32>
    tpu.vector_store %arg8[%c2, %c2_11, %c0_12], %11 {strides = array<i32>} : memref<20x20x4xf32, #tpu.memory_space<vmem>>, vector<16x16x4xf32>,
    %c0_13 = arith.constant 0 : index
    %c0_14 = arith.constant 0 : index
    %c0_15 = arith.constant 0 : index
    %13 = vector.load %arg3[%c0_13, %c0_14, %c0_15] : memref<9x4x4xbf16, #tpu.memory_space<vmem>>, vector<9x4x4xbf16>
    %c1 = arith.constant 1 : index
    %c0_16 = arith.constant 0 : index
    %14 = vector.load %arg5[%c1, %c0_16] : memref<2x4xf32, #tpu.memory_space<vmem>>, vector<1x4xf32>
    %15 = vector.shape_cast %14 : vector<1x4xf32> to vector<1x4xf32>
    %16 = vector.broadcast %15 : vector<1x4xf32> to vector<256x4xf32>
    %c0_17 = arith.constant 0 : index
    %c0_18 = arith.constant 0 : index
    %c0_19 = arith.constant 0 : index
    %17 = vector.load %arg8[%c0_17, %c0_18, %c0_19] : memref<20x20x4xf32, #tpu.memory_space<vmem>>, vector<16x16x4xf32>
    %18 = vector.shape_cast %17 : vector<16x16x4xf32> to vector<256x4xf32>
    %19 = arith.truncf %18 : vector<256x4xf32> to vector<256x4xbf16>
    %20 = vector.extract_strided_slice %13 {offsets = [0, 0, 0], sizes = [1, 4, 4], strides = [1, 1, 1]} : vector<9x4x4xbf16> to vector<1x4x4xbf16>
    %21 = vector.shape_cast %20 : vector<1x4x4xbf16> to vector<4x4xbf16>
    %cst_20 = arith.constant dense<0.000000e+00> : vector<256x4xf32>
    %22 = tpu.matmul %19, %21, %cst_20 {dimension_numbers = #tpu.dot_dimension_numbers<[1], [0], [0], [1], [0, 0, 1, 1], [], []>} : vector<256x4xbf16>, vector<4x4xbf16>, vector<256x4xf32> -> vector<256x4xf32>
    %23 = arith.addf %16, %22 : vector<256x4xf32>
    %c0_21 = arith.constant 0 : index
    %c2_22 = arith.constant 2 : index
    %c0_23 = arith.constant 0 : index
    %24 = vector.load %arg8[%c0_21, %c2_22, %c0_23] : memref<20x20x4xf32, #tpu.memory_space<vmem>>, vector<16x16x4xf32>
    %25 = vector.shape_cast %24 : vector<16x16x4xf32> to vector<256x4xf32>
    %26 = arith.truncf %25 : vector<256x4xf32> to vector<256x4xbf16>
    %27 = vector.extract_strided_slice %13 {offsets = [1, 0, 0], sizes = [1, 4, 4], strides = [1, 1, 1]} : vector<9x4x4xbf16> to vector<1x4x4xbf16>
    %28 = vector.shape_cast %27 : vector<1x4x4xbf16> to vector<4x4xbf16>
    %cst_24 = arith.constant dense<0.000000e+00> : vector<256x4xf32>
    %29 = tpu.matmul %26, %28, %cst_24 {dimension_numbers = #tpu.dot_dimension_numbers<[1], [0], [0], [1], [0, 0, 1, 1], [], []>} : vector<256x4xbf16>, vector<4x4xbf16>, vector<256x4xf32> -> vector<256x4xf32>
    %30 = arith.addf %23, %29 : vector<256x4xf32>
    %c0_25 = arith.constant 0 : index
    %c4 = arith.constant 4 : index
    %c0_26 = arith.constant 0 : index
    %31 = vector.load %arg8[%c0_25, %c4, %c0_26] : memref<20x20x4xf32, #tpu.memory_space<vmem>>, vector<16x16x4xf32>
    %32 = vector.shape_cast %31 : vector<16x16x4xf32> to vector<256x4xf32>
    %33 = arith.truncf %32 : vector<256x4xf32> to vector<256x4xbf16>
    %34 = vector.extract_strided_slice %13 {offsets = [2, 0, 0], sizes = [1, 4, 4], strides = [1, 1, 1]} : vector<9x4x4xbf16> to vector<1x4x4xbf16>
    %35 = vector.shape_cast %34 : vector<1x4x4xbf16> to vector<4x4xbf16>
    %cst_27 = arith.constant dense<0.000000e+00> : vector<256x4xf32>
    %36 = tpu.matmul %33, %35, %cst_27 {dimension_numbers = #tpu.dot_dimension_numbers<[1], [0], [0], [1], [0, 0, 1, 1], [], []>} : vector<256x4xbf16>, vector<4x4xbf16>, vector<256x4xf32> -> vector<256x4xf32>
    %37 = arith.addf %30, %36 : vector<256x4xf32>
    %c2_28 = arith.constant 2 : index
    %c0_29 = arith.constant 0 : index
    %c0_30 = arith.constant 0 : index
    %38 = vector.load %arg8[%c2_28, %c0_29, %c0_30] : memref<20x20x4xf32, #tpu.memory_space<vmem>>, vector<16x16x4xf32>
    %39 = vector.shape_cast %38 : vector<16x16x4xf32> to vector<256x4xf32>
    %40 = arith.truncf %39 : vector<256x4xf32> to vector<256x4xbf16>
    %41 = vector.extract_strided_slice %13 {offsets = [3, 0, 0], sizes = [1, 4, 4], strides = [1, 1, 1]} : vector<9x4x4xbf16> to vector<1x4x4xbf16>
    %42 = vector.shape_cast %41 : vector<1x4x4xbf16> to vector<4x4xbf16>
    %cst_31 = arith.constant dense<0.000000e+00> : vector<256x4xf32>
    %43 = tpu.matmul %40, %42, %cst_31 {dimension_numbers = #tpu.dot_dimension_numbers<[1], [0], [0], [1], [0, 0, 1, 1], [], []>} : vector<256x4xbf16>, vector<4x4xbf16>, vector<256x4xf32> -> vector<256x4xf32>
    %44 = arith.addf %37, %43 : vector<256x4xf32>
    %c2_32 = arith.constant 2 : index
    %c2_33 = arith.constant 2 : index
    %c0_34 = arith.constant 0 : index
    %45 = vector.load %arg8[%c2_32, %c2_33, %c0_34] : memref<20x20x4xf32, #tpu.memory_space<vmem>>, vector<16x16x4xf32>
    %46 = vector.shape_cast %45 : vector<16x16x4xf32> to vector<256x4xf32>
    %47 = arith.truncf %46 : vector<256x4xf32> to vector<256x4xbf16>
    %48 = vector.extract_strided_slice %13 {offsets = [4, 0, 0], sizes = [1, 4, 4], strides = [1, 1, 1]} : vector<9x4x4xbf16> to vector<1x4x4xbf16>
    %49 = vector.shape_cast %48 : vector<1x4x4xbf16> to vector<4x4xbf16>
    %cst_35 = arith.constant dense<0.000000e+00> : vector<256x4xf32>
    %50 = tpu.matmul %47, %49, %cst_35 {dimension_numbers = #tpu.dot_dimension_numbers<[1], [0], [0], [1], [0, 0, 1, 1], [], []>} : vector<256x4xbf16>, vector<4x4xbf16>, vector<256x4xf32> -> vector<256x4xf32>
    %51 = arith.addf %44, %50 : vector<256x4xf32>
    %c2_36 = arith.constant 2 : index
    %c4_37 = arith.constant 4 : index
    %c0_38 = arith.constant 0 : index
    %52 = vector.load %arg8[%c2_36, %c4_37, %c0_38] : memref<20x20x4xf32, #tpu.memory_space<vmem>>, vector<16x16x4xf32>
    %53 = vector.shape_cast %52 : vector<16x16x4xf32> to vector<256x4xf32>
    %54 = arith.truncf %53 : vector<256x4xf32> to vector<256x4xbf16>
    %55 = vector.extract_strided_slice %13 {offsets = [5, 0, 0], sizes = [1, 4, 4], strides = [1, 1, 1]} : vector<9x4x4xbf16> to vector<1x4x4xbf16>
    %56 = vector.shape_cast %55 : vector<1x4x4xbf16> to vector<4x4xbf16>
    %cst_39 = arith.constant dense<0.000000e+00> : vector<256x4xf32>
    %57 = tpu.matmul %54, %56, %cst_39 {dimension_numbers = #tpu.dot_dimension_numbers<[1], [0], [0], [1], [0, 0, 1, 1], [], []>} : vector<256x4xbf16>, vector<4x4xbf16>, vector<256x4xf32> -> vector<256x4xf32>
    %58 = arith.addf %51, %57 : vector<256x4xf32>
    %c4_40 = arith.constant 4 : index
    %c0_41 = arith.constant 0 : index
    %c0_42 = arith.constant 0 : index
    %59 = vector.load %arg8[%c4_40, %c0_41, %c0_42] : memref<20x20x4xf32, #tpu.memory_space<vmem>>, vector<16x16x4xf32>
    %60 = vector.shape_cast %59 : vector<16x16x4xf32> to vector<256x4xf32>
    %61 = arith.truncf %60 : vector<256x4xf32> to vector<256x4xbf16>
    %62 = vector.extract_strided_slice %13 {offsets = [6, 0, 0], sizes = [1, 4, 4], strides = [1, 1, 1]} : vector<9x4x4xbf16> to vector<1x4x4xbf16>
    %63 = vector.shape_cast %62 : vector<1x4x4xbf16> to vector<4x4xbf16>
    %cst_43 = arith.constant dense<0.000000e+00> : vector<256x4xf32>
    %64 = tpu.matmul %61, %63, %cst_43 {dimension_numbers = #tpu.dot_dimension_numbers<[1], [0], [0], [1], [0, 0, 1, 1], [], []>} : vector<256x4xbf16>, vector<4x4xbf16>, vector<256x4xf32> -> vector<256x4xf32>
    %65 = arith.addf %58, %64 : vector<256x4xf32>
    %c4_44 = arith.constant 4 : index
    %c2_45 = arith.constant 2 : index
    %c0_46 = arith.constant 0 : index
    %66 = vector.load %arg8[%c4_44, %c2_45, %c0_46] : memref<20x20x4xf32, #tpu.memory_space<vmem>>, vector<16x16x4xf32>
    %67 = vector.shape_cast %66 : vector<16x16x4xf32> to vector<256x4xf32>
    %68 = arith.truncf %67 : vector<256x4xf32> to vector<256x4xbf16>
    %69 = vector.extract_strided_slice %13 {offsets = [7, 0, 0], sizes = [1, 4, 4], strides = [1, 1, 1]} : vector<9x4x4xbf16> to vector<1x4x4xbf16>
    %70 = vector.shape_cast %69 : vector<1x4x4xbf16> to vector<4x4xbf16>
    %cst_47 = arith.constant dense<0.000000e+00> : vector<256x4xf32>
    %71 = tpu.matmul %68, %70, %cst_47 {dimension_numbers = #tpu.dot_dimension_numbers<[1], [0], [0], [1], [0, 0, 1, 1], [], []>} : vector<256x4xbf16>, vector<4x4xbf16>, vector<256x4xf32> -> vector<256x4xf32>
    %72 = arith.addf %65, %71 : vector<256x4xf32>
    %c4_48 = arith.constant 4 : index
    %c4_49 = arith.constant 4 : index
    %c0_50 = arith.constant 0 : index
    %73 = vector.load %arg8[%c4_48, %c4_49, %c0_50] : memref<20x20x4xf32, #tpu.memory_space<vmem>>, vector<16x16x4xf32>
    %74 = vector.shape_cast %73 : vector<16x16x4xf32> to vector<256x4xf32>
    %75 = arith.truncf %74 : vector<256x4xf32> to vector<256x4xbf16>
    %76 = vector.extract_strided_slice %13 {offsets = [8, 0, 0], sizes = [1, 4, 4], strides = [1, 1, 1]} : vector<9x4x4xbf16> to vector<1x4x4xbf16>
    %77 = vector.shape_cast %76 : vector<1x4x4xbf16> to vector<4x4xbf16>
    %cst_51 = arith.constant dense<0.000000e+00> : vector<256x4xf32>
    %78 = tpu.matmul %75, %77, %cst_51 {dimension_numbers = #tpu.dot_dimension_numbers<[1], [0], [0], [1], [0, 0, 1, 1], [], []>} : vector<256x4xbf16>, vector<4x4xbf16>, vector<256x4xf32> -> vector<256x4xf32>
    %79 = arith.addf %72, %78 : vector<256x4xf32>
    %cst_52 = arith.constant 0.000000e+00 : f32
    %80 = vector.broadcast %cst_52 : f32 to vector<256x4xf32>
    %81 = arith.maximumf %79, %80 : vector<256x4xf32>
    %82 = arith.truncf %81 : vector<256x4xf32> to vector<256x4xbf16>
    %c0_53 = arith.constant 0 : index
    %c0_54 = arith.constant 0 : index
    %83 = vector.load %arg4[%c0_53, %c0_54] : memref<4x8xbf16, #tpu.memory_space<vmem>>, vector<4x8xbf16>
    %cst_55 = arith.constant dense<0.000000e+00> : vector<256x8xf32>
    %84 = tpu.matmul %82, %83, %cst_55 {dimension_numbers = #tpu.dot_dimension_numbers<[1], [0], [0], [1], [0, 0, 1, 1], [], []>} : vector<256x4xbf16>, vector<4x8xbf16>, vector<256x8xf32> -> vector<256x8xf32>
    %c0_56 = arith.constant 0 : index
    %c0_57 = arith.constant 0 : index
    %85 = vector.load %arg6[%c0_56, %c0_57] : memref<1x8xf32, #tpu.memory_space<vmem>>, vector<1x8xf32>
    %86 = vector.broadcast %85 : vector<1x8xf32> to vector<256x8xf32>
    %87 = arith.addf %84, %86 : vector<256x8xf32>
    %88 = arith.extf %1 : vector<256x8xbf16> to vector<256x8xf32>
    %89 = arith.addf %87, %88 : vector<256x8xf32>
    %cst_58 = arith.constant 0.000000e+00 : f32
    %90 = vector.broadcast %cst_58 : f32 to vector<256x8xf32>
    %91 = arith.maximumf %89, %90 : vector<256x8xf32>
    %c0_59 = arith.constant 0 : index
    %c0_60 = arith.constant 0 : index
    %c0_61 = arith.constant 0 : index
    %92 = vector.load %arg7[%c0_59, %c0_60, %c0_61] : memref<1x256x8xf32, #tpu.memory_space<vmem>>, vector<1x256x8xf32>
    %93 = vector.shape_cast %92 : vector<1x256x8xf32> to vector<256x8xf32>
    %94 = vector.shape_cast %91 : vector<256x8xf32> to vector<1x256x8xf32>
    tpu.vector_store %arg7[%c0_59, %c0_60, %c0_61], %94 {strides = array<i32>} : memref<1x256x8xf32, #tpu.memory_space<vmem>>, vector<1x256x8xf32>,
    return
  }
  func.func @transform_0(%arg0: i32) -> (i32, i32, i32) {
    %c0_i32 = arith.constant 0 : i32
    %c0_i32_0 = arith.constant 0 : i32
    %c0_i32_1 = arith.constant 0 : i32
    return %arg0, %c0_i32, %c0_i32_0 : i32, i32, i32
  }
  func.func @transform_1(%arg0: i32) -> (i32, i32) {
    %c0_i32 = arith.constant 0 : i32
    %c0_i32_0 = arith.constant 0 : i32
    %c0_i32_1 = arith.constant 0 : i32
    return %c0_i32, %c0_i32_0 : i32, i32
  }
  func.func @transform_2(%arg0: i32) -> (i32, i32, i32) {
    %c0_i32 = arith.constant 0 : i32
    %c0_i32_0 = arith.constant 0 : i32
    %c0_i32_1 = arith.constant 0 : i32
    %c0_i32_2 = arith.constant 0 : i32
    return %c0_i32, %c0_i32_0, %c0_i32_1 : i32, i32, i32
  }
  func.func @transform_3(%arg0: i32) -> (i32, i32) {
    %c0_i32 = arith.constant 0 : i32
    %c0_i32_0 = arith.constant 0 : i32
    %c0_i32_1 = arith.constant 0 : i32
    return %c0_i32, %c0_i32_0 : i32, i32
  }
  func.func @transform_4(%arg0: i32) -> (i32, i32) {
    %c0_i32 = arith.constant 0 : i32
    %c0_i32_0 = arith.constant 0 : i32
    %c0_i32_1 = arith.constant 0 : i32
    return %c0_i32, %c0_i32_0 : i32, i32
  }
  func.func @transform_5(%arg0: i32) -> (i32, i32) {
    %c0_i32 = arith.constant 0 : i32
    %c0_i32_0 = arith.constant 0 : i32
    %c0_i32_1 = arith.constant 0 : i32
    return %c0_i32, %c0_i32_0 : i32, i32
  }
  func.func @transform_6(%arg0: i32) -> (i32, i32, i32) {
    %c0_i32 = arith.constant 0 : i32
    %c0_i32_0 = arith.constant 0 : i32
    %c0_i32_1 = arith.constant 0 : i32
    return %arg0, %c0_i32, %c0_i32_0 : i32, i32, i32
  }
}

</mosaic_0001>

<bundles_post_ra>
// kernel: tpu_custom_call.1
= control target key start
LH: loop header
LB: loop body
LE: loop exit
PB: predicated region body
PF: predicated region fallthrough
CT: control target
= control target key end

     0   :  { %s4691_s21 = smov 0   ;;  %s5972_s0 = inlined_call_operand.vmem [shape: bf16[2,256,8], index: 0, kind: input, shape index: {}]   ;;  %s5973_s1 = inlined_call_operand.vmem [shape: bf16[8,4], index: 1, kind: input, shape index: {}]   ;;  %s5974_s2 = inlined_call_operand.vmem [shape: bf16[9,4,4], index: 2, kind: input, shape index: {}]   ;;  %s5975_s3 = inlined_call_operand.vmem [shape: bf16[4,8], index: 3, kind: input, shape index: {}]   ;;  %s5976_s4 = inlined_call_operand.vmem [shape: f32[2,4], index: 4, kind: input, shape index: {}]   ;;  %s5977_s5 = inlined_call_operand.vmem [shape: f32[1,8], index: 5, kind: input, shape index: {}]   ;;  %s5978_s6 = inlined_call_operand.vmem [shape: f32[2,256,8], index: 6, kind: output, shape index: {}]  }
   0x1 LB: > { %s3807_s22 = sadd.s32 4294967295, %s4653_s21   ;;  %p3811_p0 = scmp.ge.s32.totalorder %s4653_s21, 1  ;;  %s4653_s21 = sphi %s4691_s21, %s16_s21  }
   0x2   : > { %p212_p1 = scmp.lt.s32.totalorder %s4653_s21, 3 }
   0x4   : > { %p213_p2 = pnand %p3811_p0, %p212_p1 }
   0x6   : > { %216 = sbr.rel (%p213_p2) target bundleno = 948 (0x3b4), region = 44 }
   0xb   : > { %v285_v0 = vld [vmem:[%s5973_s1] sm:$0xf]  ;;  %vm420_vm0 = vcmask 1043456   ;;  %p242_p3 = scmp.lt.s32.totalorder %s3807_s22, 1  ;;  %vm822_vm1 = vcmask 1041408   ;;  %vm371_vm2 = vcmask 64512  }
   0xc   : > { %4578 = vmatprep.subr.msk.bf16.mxu0 %vm420_vm0, %v285_v0  ;;  %v422_v1 = vsel %vm420_vm0, %v285_v0, 0  ;;  %4579 = vmatprep.subr.msk.bf16.mxu1 %vm420_vm0, %v285_v0  ;;  %v712_v2 = vld [vmem:[%s5974_s2] sm:$0x3]  ;;  %vm617_vm3 = vcmask 31744   ;;  %v4655_v20 = vmov 0.0   ;;  %vm620_vm4 = vcmask 27648  }
   0xd   : > { %4203 = vmatpush3.bf16.msra.mxu0 %v422_v1  ;;  %s6034_s22 = smov (!%p242_p3, %s3807_s22), 1  ;;  %4577 = vmatpush3.bf16.msra.mxu1 %v422_v1  ;;  %v824_v9 = vsel %vm822_vm1, %v712_v2, 0  ;;  %628 = vst.msk [vmem:[#allocation2 + $0x48] sm:$0xff] %vm617_vm3, %v4655_v20  ;;  %629 = vst.msk [vmem:[#allocation2 + $0x50] sm:$0xff] %vm617_vm3, %v4655_v20  ;;  %v713_v23 = vld [vmem:[%s5974_s2 + $0x2] sm:$0x3] }
   0xe   : > { %4580 = vmatprep.subr.msk.bf16.mxu1 %vm822_vm1, %v712_v2  ;;  %s4013_s27 = sshll.u32 %s6034_s22, 7  ;;  %618 = vst.msk [vmem:[#allocation2] sm:$0xff] %vm617_vm3, %v4655_v20  ;;  %619 = vst.msk [vmem:[#allocation2 + $0x8] sm:$0xff] %vm617_vm3, %v4655_v20  ;;  %4581 = vmatprep.subr.msk.bf16.mxu0 %vm822_vm1, %v713_v23  ;;  %v1116_v27 = vsel %vm822_vm1, %v713_v23, 0  ;;  %v714_v35 = vld [vmem:[%s5974_s2 + $0x4] sm:$0x3] }
   0xf   : > { %s4712_s30 = scalar_lea.vmem %s5972_s0, %s4013_s27  ;;  %622 = vst.msk [vmem:[#allocation2 + $0x18] sm:$0xff] %vm617_vm3, %v4655_v20  ;;  %623 = vst.msk [vmem:[#allocation2 + $0x20] sm:$0xff] %vm617_vm3, %v4655_v20  ;;  %v1408_v36 = vsel %vm822_vm1, %v714_v35, 0  ;;  %v715_v37 = vld [vmem:[%s5974_s2 + $0x6] sm:$0x3]  ;;  %s4014_s10 = sshll.u32 %s6034_s22, 8 }
  0x10   : > { %v253_v3 = vld [vmem:[%s4712_s30] sm:$0xff]   ;;  %v255_v4 = vld [vmem:[%s4712_s30 + $0x8] sm:$0xff]   ;;  %v257_v5 = vld [vmem:[%s4712_s30 + $0x10] sm:$0xff]   ;;  %625 = vst.msk [vmem:[#allocation2 + $0x30] sm:$0xff] %vm617_vm3, %v4655_v20  ;;  %v1700_v38 = vsel %vm822_vm1, %v715_v37, 0  ;;  %s5859_s13 = scalar_lea.vmem %s5978_s6, %s4014_s10 }
  0x11   : > { %v269_v6 = vld [vmem:[%s4712_s30 + $0x40] sm:$0xff]   ;;  %4204 = vmatprep.mubr.msk.bf16.mxu0 %vm371_vm2, %v253_v3  ;;  %v271_v7 = vld [vmem:[%s4712_s30 + $0x48] sm:$0xff]   ;;  %v273_v8 = vld [vmem:[%s4712_s30 + $0x50] sm:$0xff]   ;;  %626 = vst.msk [vmem:[#allocation2 + $0x38] sm:$0xff] %vm617_vm3, %v4655_v20 }
  0x12   : > { %4205 = vmatmul.mubr.msk.bf16.vlgmr.msra.gmra.mxu0 %vm371_vm2, %v255_v4  ;;  %v259_v10 = vld [vmem:[%s4712_s30 + $0x18] sm:$0xff]   ;;  %4220 = vmatprep.mubr.msk.bf16.mxu1 %vm371_vm2, %v269_v6  ;;  %v261_v11 = vld [vmem:[%s4712_s30 + $0x20] sm:$0xff]   ;;  %v263_v14 = vld [vmem:[%s4712_s30 + $0x28] sm:$0xff]   ;;  %631 = vst.msk [vmem:[#allocation2 + $0x60] sm:$0xff] %vm617_vm3, %v4655_v20 }
  0x13   : > { %4208 = vmatprep.mubr.msk.bf16.mxu0 %vm371_vm2, %v257_v5  ;;  %4221 = vmatmul.mubr.msk.bf16.vlgmr.msra.gmra.mxu1 %vm371_vm2, %v271_v7  ;;  %v275_v12 = vld [vmem:[%s4712_s30 + $0x58] sm:$0xff]   ;;  %v277_v13 = vld [vmem:[%s4712_s30 + $0x60] sm:$0xff]   ;;  %v265_v15 = vld [vmem:[%s4712_s30 + $0x30] sm:$0xff]   ;;  %632 = vst.msk [vmem:[#allocation2 + $0x68] sm:$0xff] %vm617_vm3, %v4655_v20 }
  0x14   : > { %4224 = vmatprep.mubr.msk.bf16.mxu1 %vm371_vm2, %v273_v8  ;;  %4237 = vmatpush3.bf16.msra.mxu1 %v824_v9  ;;  %v279_v16 = vld [vmem:[%s4712_s30 + $0x68] sm:$0xff]   ;;  %v281_v17 = vld [vmem:[%s4712_s30 + $0x70] sm:$0xff]   ;;  %v267_v18 = vld [vmem:[%s4712_s30 + $0x38] sm:$0xff]   ;;  %634 = vst.msk [vmem:[#allocation2 + $0x78] sm:$0xff] %vm617_vm3, %v4655_v20 }
  0x15   : > { %v283_v19 = vld [vmem:[%s4712_s30 + $0x78] sm:$0xff]   ;;  %635 = vst.msk [vmem:[#allocation2 + $0x80] sm:$0xff] %vm617_vm3, %v4655_v20  ;;  %637 = vst.msk [vmem:[#allocation2 + $0x90] sm:$0xff] %vm617_vm3, %v4655_v20  ;;  %v726_v21 = vld [vmem:[#allocation2] sm:$0xff]  ;;  %4271 = vmatpush3.bf16.msra.mxu0 %v1116_v27  ;;  %4582 = vmatprep.subr.msk.bf16.mxu1 %vm822_vm1, %v714_v35 }
  0x16   : > { %638 = vst.msk [vmem:[#allocation2 + $0x98] sm:$0xff] %vm617_vm3, %v4655_v20  ;;  %640 = vst.msk [vmem:[#allocation2 + $0xa8] sm:$0xff] %vm617_vm3, %v4655_v20  ;;  %v727_v22 = vld [vmem:[#allocation2 + $0x8] sm:$0xff]  ;;  %v728_v25 = vld [vmem:[#allocation2 + $0x18] sm:$0xff]  ;;  %4583 = vmatprep.subr.msk.bf16.mxu0 %vm822_vm1, %v715_v37 }
  0x17   : > { %641 = vst.msk [vmem:[#allocation2 + $0xb0] sm:$0xff] %vm617_vm3, %v4655_v20  ;;  %643 = vst.msk [vmem:[#allocation2 + $0xc0] sm:$0xff] %vm617_vm3, %v4655_v20  ;;  %v758_v24 = vpack.c.bf16 %v727_v22, %v726_v21  ;;  %v729_v26 = vld [vmem:[#allocation2 + $0x20] sm:$0xff]  ;;  %v4829_v39 = vld [vmem:[%s5974_s2 + $0x8] sm:$0x3] }
  0x18   : > { %644 = vst.msk [vmem:[#allocation2 + $0xc8] sm:$0xff] %vm617_vm3, %v4655_v20  ;;  %646 = vst.msk [vmem:[#allocation2 + $0xd8] sm:$0xff] %vm617_vm3, %v4655_v20  ;;  %v759_v28 = vpack.c.bf16 %v729_v26, %v728_v25  ;;  %v1019_v29 = vld [vmem:[#allocation2 + $0x2] sm:$0xff]  ;;  %v1021_v32 = vld [vmem:[#allocation2 + $0x1a] sm:$0xff] }
  0x19   : > { %647 = vst.msk [vmem:[#allocation2 + $0xe0] sm:$0xff] %vm617_vm3, %v4655_v20  ;;  %649 = vst.msk [vmem:[#allocation2 + $0xf0] sm:$0xff] %vm617_vm3, %v4655_v20  ;;  %v4836_v40 = vld [vmem:[%s5976_s4] ss:$0 sm:$0xff]  ;;  %v4851_v60 = vld [vmem:[%s5974_s2 + $0xa] sm:$0x3] }
  0x1a   : > { %4209 = vmatmul.mubr.msk.bf16.gmra.mxu0 %vm371_vm2, %v259_v10  ;;  %650 = vst.msk [vmem:[#allocation2 + $0xf8] sm:$0xff] %vm617_vm3, %v4655_v20  ;;  %652 = vst.msk [vmem:[#allocation2 + $0x108] sm:$0xff] %vm617_vm3, %v4655_v20 }
  0x1b   : > { %4212 = vmatprep.mubr.msk.bf16.mxu0 %vm371_vm2, %v261_v11  ;;  %4225 = vmatmul.mubr.msk.bf16.gmra.mxu1 %vm371_vm2, %v275_v12  ;;  %653 = vst.msk [vmem:[#allocation2 + $0x110] sm:$0xff] %vm617_vm3, %v4655_v20  ;;  %655 = vst.msk [vmem:[#allocation2 + $0x120] sm:$0xff] %vm617_vm3, %v4655_v20 }
  0x1c   : > { %4228 = vmatprep.mubr.msk.bf16.mxu1 %vm371_vm2, %v277_v13  ;;  %656 = vst.msk [vmem:[#allocation2 + $0x128] sm:$0xff] %vm617_vm3, %v4655_v20  ;;  %658 = vst.msk [vmem:[#allocation2 + $0x138] sm:$0xff] %vm617_vm3, %v4655_v20 }
  0x1d   : > { %659 = vst.msk [vmem:[#allocation2 + $0x140] sm:$0xff] %vm617_vm3, %v4655_v20  ;;  %661 = vst.msk [vmem:[#allocation2 + $0x150] sm:$0xff] %vm617_vm3, %v4655_v20 }
  0x1e   : > { %662 = vst.msk [vmem:[#allocation2 + $0x158] sm:$0xff] %vm617_vm3, %v4655_v20  ;;  %664 = vst.msk [vmem:[#allocation2 + $0x168] sm:$0xff] %vm617_vm3, %v4655_v20 }
  0x1f   : > { %665 = vst.msk [vmem:[#allocation2 + $0x170] sm:$0xff] %vm617_vm3, %v4655_v20  ;;  %667 = vst.msk [vmem:[#allocation2 + $0x180] sm:$0xff] %vm617_vm3, %v4655_v20 }
  0x20   : > { %668 = vst.msk [vmem:[#allocation2 + $0x188] sm:$0xff] %vm617_vm3, %v4655_v20  ;;  %670 = vst.msk [vmem:[#allocation2 + $0x198] sm:$0xff] %vm617_vm3, %v4655_v20 }
  0x21   : > { %671 = vst.msk [vmem:[#allocation2 + $0x1a0] sm:$0xff] %vm617_vm3, %v4655_v20  ;;  %673 = vst.msk [vmem:[#allocation2 + $0x1b0] sm:$0xff] %vm617_vm3, %v4655_v20 }
  0x22   : > { %4213 = vmatmul.mubr.msk.bf16.gmra.mxu0 %vm371_vm2, %v263_v14  ;;  %674 = vst.msk [vmem:[#allocation2 + $0x1b8] sm:$0xff] %vm617_vm3, %v4655_v20  ;;  %676 = vst.msk [vmem:[#allocation2 + $0x1c8] sm:$0xff] %vm617_vm3, %v4655_v20 }
  0x23   : > { %4216 = vmatprep.mubr.msk.bf16.mxu0 %vm371_vm2, %v265_v15  ;;  %4229 = vmatmul.mubr.msk.bf16.gmra.mxu1 %vm371_vm2, %v279_v16  ;;  %677 = vst.msk [vmem:[#allocation2 + $0x1d0] sm:$0xff] %vm617_vm3, %v4655_v20 }
  0x24   : > { %4232 = vmatprep.mubr.msk.bf16.mxu1 %vm371_vm2, %v281_v17  ;;  %630 = vst.msk [vmem:[#allocation2 + $0x58] sm:$0xf] %vm620_vm4, %v4655_v20  ;;  %621 = vst.msk [vmem:[#allocation2 + $0x10] sm:$0xf] %vm620_vm4, %v4655_v20 }
  0x25   : > { %624 = vst.msk [vmem:[#allocation2 + $0x28] sm:$0xf] %vm620_vm4, %v4655_v20  ;;  %627 = vst.msk [vmem:[#allocation2 + $0x40] sm:$0xf] %vm620_vm4, %v4655_v20 }
  0x26   : > { %633 = vst.msk [vmem:[#allocation2 + $0x70] sm:$0xf] %vm620_vm4, %v4655_v20  ;;  %636 = vst.msk [vmem:[#allocation2 + $0x88] sm:$0xf] %vm620_vm4, %v4655_v20 }
  0x27   : > { %639 = vst.msk [vmem:[#allocation2 + $0xa0] sm:$0xf] %vm620_vm4, %v4655_v20  ;;  %642 = vst.msk [vmem:[#allocation2 + $0xb8] sm:$0xf] %vm620_vm4, %v4655_v20 }
  0x28   : > { %645 = vst.msk [vmem:[#allocation2 + $0xd0] sm:$0xf] %vm620_vm4, %v4655_v20  ;;  %648 = vst.msk [vmem:[#allocation2 + $0xe8] sm:$0xf] %vm620_vm4, %v4655_v20 }
  0x29   : > { %651 = vst.msk [vmem:[#allocation2 + $0x100] sm:$0xf] %vm620_vm4, %v4655_v20  ;;  %654 = vst.msk [vmem:[#allocation2 + $0x118] sm:$0xf] %vm620_vm4, %v4655_v20 }
  0x2a   : > { %4217 = vmatmul.mubr.msk.bf16.gmra.mxu0 %vm371_vm2, %v267_v18  ;;  %657 = vst.msk [vmem:[#allocation2 + $0x130] sm:$0xf] %vm620_vm4, %v4655_v20  ;;  %660 = vst.msk [vmem:[#allocation2 + $0x148] sm:$0xf] %vm620_vm4, %v4655_v20 }
  0x2b   : > { %4233 = vmatmul.mubr.msk.bf16.gmra.mxu1 %vm371_vm2, %v283_v19  ;;  %663 = vst.msk [vmem:[#allocation2 + $0x160] sm:$0xf] %vm620_vm4, %v4655_v20  ;;  %666 = vst.msk [vmem:[#allocation2 + $0x178] sm:$0xf] %vm620_vm4, %v4655_v20  ;;  %v1020_v30 = vld [vmem:[#allocation2 + $0xa] sm:$0xff] }
  0x2c   : > { %669 = vst.msk [vmem:[#allocation2 + $0x190] sm:$0xf] %vm620_vm4, %v4655_v20  ;;  %672 = vst.msk [vmem:[#allocation2 + $0x1a8] sm:$0xf] %vm620_vm4, %v4655_v20  ;;  %4238 = vmatprep.mubr.msk.bf16.mxu1 %vm617_vm3, %v758_v24  ;;  %v1051_v31 = vpack.c.bf16 %v1020_v30, %v1019_v29  ;;  %v1022_v33 = vld [vmem:[#allocation2 + $0x22] sm:$0xff] }
  0x2d   : > { %675 = vst.msk [vmem:[#allocation2 + $0x1c0] sm:$0xf] %vm620_vm4, %v4655_v20  ;;  %678 = vst.msk [vmem:[#allocation2 + $0x1d8] sm:$0xf] %vm620_vm4, %v4655_v20  ;;  %v1052_v34 = vpack.c.bf16 %v1022_v33, %v1021_v32 }
  0x2e   : > { %4272 = vmatprep.mubr.msk.bf16.mxu0 %vm617_vm3, %v1051_v31 }
  0x32   : > { %4273 = vmatmul.mubr.msk.bf16.vlgmr.msra.gmra.mxu0 %vm617_vm3, %v1052_v34 }
  0x33   : > { %4239 = vmatmul.mubr.msk.bf16.vlgmr.msra.gmra.mxu1 %vm617_vm3, %v759_v28  ;;  %4339 = vmatpush3.bf16.msra.mxu0 %v1700_v38 }
  0x34   : > { %4305 = vmatpush3.bf16.msra.mxu1 %v1408_v36  ;;  %4585 = vmatprep.subr.msk.bf16.mxu0 %vm822_vm1, %v4851_v60 }
  0x35   : > { %4584 = vmatprep.subr.msk.bf16.mxu1 %vm822_vm1, %v4829_v39 }
  0xd2   : > { %v4206_v41 = vpop.f32.mrf.mxu0 }
  0xd3   : > { %v467_v42 = vadd.f32 %v4206_v41, %v4836_v40  ;;  %v4222_v44 = vpop.f32.mrf.mxu1 }
  0xd4   : > { %v458_v43 = vpop.f32.mrf.mxu0  ;;  %v531_v47 = vadd.f32 %v4222_v44, %v4836_v40 }
  0xd5   : > { %v587_v45 = vmax.f32 %v467_v42, 0.0  ;;  %v459_v46 = vadd.f32 %v4836_v40, %v458_v43  ;;  %v522_v49 = vpop.f32.mrf.mxu1 }
  0xd6   : > { %v4207_v48 = vpop.f32.mrf.mxu0  ;;  %v603_v52 = vmax.f32 %v531_v47, 0.0  ;;  %v523_v53 = vadd.f32 %v4836_v40, %v522_v49 }
  0xd7   : > { %682 = vst.msk [vmem:[#allocation2 + $0x4a] sm:$0xff] %vm617_vm3, %v587_v45  ;;  %v585_v50 = vmax.f32 %v459_v46, 0.0  ;;  %v470_v51 = vadd.f32 %v4207_v48, %v4836_v40  ;;  %v4223_v55 = vpop.f32.mrf.mxu1 }
  0xd8   : > { %v461_v54 = vpop.f32.mrf.mxu0  ;;  %698 = vst.msk [vmem:[#allocation2 + $0x10a] sm:$0xff] %vm617_vm3, %v603_v52  ;;  %v601_v58 = vmax.f32 %v523_v53, 0.0  ;;  %v534_v59 = vadd.f32 %v4223_v55, %v4836_v40 }
  0xd9   : > { %680 = vst.msk [vmem:[#allocation2 + $0x32] sm:$0xff] %vm617_vm3, %v585_v50  ;;  %v588_v56 = vmax.f32 %v470_v51, 0.0  ;;  %v462_v57 = vadd.f32 %v4836_v40, %v461_v54  ;;  %v525_v62 = vpop.f32.mrf.mxu1 }
  0xda   : > { %v4210_v61 = vpop.f32.mrf.mxu0  ;;  %696 = vst.msk [vmem:[#allocation2 + $0xf2] sm:$0xff] %vm617_vm3, %v601_v58  ;;  %v604_v1 = vmax.f32 %v534_v59, 0.0  ;;  %v526_v2 = vadd.f32 %v4836_v40, %v525_v62 }
  0xdb   : > { %683 = vst.msk [vmem:[#allocation2 + $0x52] sm:$0xff] %vm617_vm3, %v588_v56  ;;  %v586_v63 = vmax.f32 %v462_v57, 0.0  ;;  %v483_v0 = vadd.f32 %v4210_v61, %v4836_v40  ;;  %v4226_v4 = vpop.f32.mrf.mxu1 }
  0xdc   : > { %v474_v3 = vpop.f32.mrf.mxu0  ;;  %699 = vst.msk [vmem:[#allocation2 + $0x112] sm:$0xff] %vm617_vm3, %v604_v1  ;;  %v602_v7 = vmax.f32 %v526_v2, 0.0  ;;  %v547_v8 = vadd.f32 %v4226_v4, %v4836_v40 }
  0xdd   : > { %681 = vst.msk [vmem:[#allocation2 + $0x3a] sm:$0xff] %vm617_vm3, %v586_v63  ;;  %v591_v5 = vmax.f32 %v483_v0, 0.0  ;;  %v475_v6 = vadd.f32 %v4836_v40, %v474_v3  ;;  %v538_v10 = vpop.f32.mrf.mxu1 }
  0xde   : > { %v4211_v9 = vpop.f32.mrf.mxu0  ;;  %697 = vst.msk [vmem:[#allocation2 + $0xfa] sm:$0xff] %vm617_vm3, %v602_v7  ;;  %v607_v13 = vmax.f32 %v547_v8, 0.0  ;;  %v539_v14 = vadd.f32 %v4836_v40, %v538_v10  ;;  %v732_v41 = vld [vmem:[#allocation2 + $0x48] sm:$0xff] }
  0xdf   : > { %686 = vst.msk [vmem:[#allocation2 + $0x7a] sm:$0xff] %vm617_vm3, %v591_v5  ;;  %v589_v11 = vmax.f32 %v475_v6, 0.0  ;;  %v486_v12 = vadd.f32 %v4211_v9, %v4836_v40  ;;  %v4227_v16 = vpop.f32.mrf.mxu1  ;;  %v1025_v42 = vld [vmem:[#allocation2 + $0x4a] sm:$0xff] }
  0xe0   : > { %v477_v15 = vpop.f32.mrf.mxu0  ;;  %702 = vst.msk [vmem:[#allocation2 + $0x13a] sm:$0xff] %vm617_vm3, %v607_v13  ;;  %v605_v19 = vmax.f32 %v539_v14, 0.0  ;;  %v550_v20 = vadd.f32 %v4227_v16, %v4836_v40  ;;  %v730_v25 = vld [vmem:[#allocation2 + $0x30] sm:$0xff] }
  0xe1   : > { %684 = vst.msk [vmem:[#allocation2 + $0x62] sm:$0xff] %vm617_vm3, %v589_v11  ;;  %v592_v17 = vmax.f32 %v486_v12, 0.0  ;;  %v478_v18 = vadd.f32 %v4836_v40, %v477_v15  ;;  %v541_v22 = vpop.f32.mrf.mxu1  ;;  %v1023_v30 = vld [vmem:[#allocation2 + $0x32] sm:$0xff] }
  0xe2   : > { %v4214_v21 = vpop.f32.mrf.mxu0  ;;  %v733_v26 = vld [vmem:[#allocation2 + $0x50] sm:$0xff]  ;;  %700 = vst.msk [vmem:[#allocation2 + $0x122] sm:$0xff] %vm617_vm3, %v605_v19  ;;  %v608_v32 = vmax.f32 %v550_v20, 0.0  ;;  %v542_v33 = vadd.f32 %v4836_v40, %v541_v22 }
  0xe3   : > { %687 = vst.msk [vmem:[#allocation2 + $0x82] sm:$0xff] %vm617_vm3, %v592_v17  ;;  %v590_v23 = vmax.f32 %v478_v18, 0.0  ;;  %v499_v24 = vadd.f32 %v4214_v21, %v4836_v40  ;;  %v1026_v27 = vld [vmem:[#allocation2 + $0x52] sm:$0xff]  ;;  %v4230_v34 = vpop.f32.mrf.mxu1  ;;  %v4881_v44 = vpack.c.bf16 %v733_v26, %v732_v41 }
  0xe4   : > { %v490_v28 = vpop.f32.mrf.mxu0  ;;  %v731_v29 = vld [vmem:[#allocation2 + $0x38] sm:$0xff]  ;;  %v4883_v45 = vpack.c.bf16 %v1026_v27, %v1025_v42  ;;  %703 = vst.msk [vmem:[#allocation2 + $0x142] sm:$0xff] %vm617_vm3, %v608_v32  ;;  %v606_v46 = vmax.f32 %v542_v33, 0.0  ;;  %v563_v47 = vadd.f32 %v4230_v34, %v4836_v40 }
  0xe5   : > { %v1024_v31 = vld [vmem:[#allocation2 + $0x3a] sm:$0xff]  ;;  %685 = vst.msk [vmem:[#allocation2 + $0x6a] sm:$0xff] %vm617_vm3, %v590_v23  ;;  %v595_v35 = vmax.f32 %v499_v24, 0.0  ;;  %v491_v36 = vadd.f32 %v4836_v40, %v490_v28  ;;  %v4877_v37 = vpack.c.bf16 %v731_v29, %v730_v25  ;;  %v554_v48 = vpop.f32.mrf.mxu1 }
  0xe6   : > { %v4879_v38 = vpack.c.bf16 %v1024_v31, %v1023_v30  ;;  %v4215_v43 = vpop.f32.mrf.mxu0  ;;  %v555_v51 = vadd.f32 %v4836_v40, %v554_v48  ;;  %701 = vst.msk [vmem:[#allocation2 + $0x12a] sm:$0xff] %vm617_vm3, %v606_v46  ;;  %v611_v53 = vmax.f32 %v563_v47, 0.0  ;;  %v736_v14 = vld [vmem:[#allocation2 + $0x78] sm:$0xff] }
  0xe7   : > { %690 = vst.msk [vmem:[#allocation2 + $0xaa] sm:$0xff] %vm617_vm3, %v595_v35  ;;  %v593_v49 = vmax.f32 %v491_v36, 0.0  ;;  %v502_v50 = vadd.f32 %v4215_v43, %v4836_v40  ;;  %4242 = vmatprep.mubr.msk.bf16.mxu1 %vm617_vm3, %v4877_v37  ;;  %v4231_v54 = vpop.f32.mrf.mxu1  ;;  %v1029_v15 = vld [vmem:[#allocation2 + $0x7a] sm:$0xff] }
  0xe8   : > { %4276 = vmatprep.mubr.msk.bf16.mxu0 %vm617_vm3, %v4879_v38  ;;  %v493_v52 = vpop.f32.mrf.mxu0  ;;  %4243 = vmatmul.mubr.msk.bf16.gmra.mxu1 %vm617_vm3, %v4881_v44  ;;  %v609_v57 = vmax.f32 %v555_v51, 0.0  ;;  %v566_v58 = vadd.f32 %v4231_v54, %v4836_v40  ;;  %706 = vst.msk [vmem:[#allocation2 + $0x16a] sm:$0xff] %vm617_vm3, %v611_v53  ;;  %v734_v0 = vld [vmem:[#allocation2 + $0x60] sm:$0xff] }
  0xe9   : > { %4277 = vmatmul.mubr.msk.bf16.gmra.mxu0 %vm617_vm3, %v4883_v45  ;;  %688 = vst.msk [vmem:[#allocation2 + $0x92] sm:$0xff] %vm617_vm3, %v593_v49  ;;  %v596_v55 = vmax.f32 %v502_v50, 0.0  ;;  %v494_v56 = vadd.f32 %v4836_v40, %v493_v52  ;;  %v557_v61 = vpop.f32.mrf.mxu1  ;;  %v1027_v5 = vld [vmem:[#allocation2 + $0x62] sm:$0xff] }
  0xea   : > { %v4218_v59 = vpop.f32.mrf.mxu0  ;;  %v737_v1 = vld [vmem:[#allocation2 + $0x80] sm:$0xff]  ;;  %704 = vst.msk [vmem:[#allocation2 + $0x152] sm:$0xff] %vm617_vm3, %v609_v57  ;;  %v612_v7 = vmax.f32 %v566_v58, 0.0  ;;  %v558_v8 = vadd.f32 %v4836_v40, %v557_v61 }
  0xeb   : > { %691 = vst.msk [vmem:[#allocation2 + $0xb2] sm:$0xff] %vm617_vm3, %v596_v55  ;;  %v594_v62 = vmax.f32 %v494_v56, 0.0  ;;  %v515_v63 = vadd.f32 %v4218_v59, %v4836_v40  ;;  %v1030_v2 = vld [vmem:[#allocation2 + $0x82] sm:$0xff]  ;;  %v4234_v9 = vpop.f32.mrf.mxu1  ;;  %v4913_v17 = vpack.c.bf16 %v737_v1, %v736_v14  ;;  %v747_v55 = vld [vmem:[#allocation2 + $0xf8] sm:$0xff] }
  0xec   : > { %v506_v3 = vpop.f32.mrf.mxu0  ;;  %v735_v4 = vld [vmem:[#allocation2 + $0x68] sm:$0xff]  ;;  %v4915_v18 = vpack.c.bf16 %v1030_v2, %v1029_v15  ;;  %707 = vst.msk [vmem:[#allocation2 + $0x172] sm:$0xff] %vm617_vm3, %v612_v7  ;;  %v610_v19 = vmax.f32 %v558_v8, 0.0  ;;  %v579_v23 = vadd.f32 %v4234_v9, %v4836_v40  ;;  %v1039_v56 = vld [vmem:[#allocation2 + $0xf2] sm:$0xff]  ;;  %v1040_v57 = vld [vmem:[#allocation2 + $0xfa] sm:$0xff] }
  0xed   : > { %v1028_v6 = vld [vmem:[#allocation2 + $0x6a] sm:$0xff]  ;;  %689 = vst.msk [vmem:[#allocation2 + $0x9a] sm:$0xff] %vm617_vm3, %v594_v62  ;;  %v599_v10 = vmax.f32 %v515_v63, 0.0  ;;  %v507_v11 = vadd.f32 %v4836_v40, %v506_v3  ;;  %v4909_v12 = vpack.c.bf16 %v735_v4, %v734_v0  ;;  %v570_v20 = vpop.f32.mrf.mxu1  ;;  %v1043_v14 = vld [vmem:[#allocation2 + $0x122] sm:$0xff] }
  0xee   : > { %v4911_v13 = vpack.c.bf16 %v1028_v6, %v1027_v5  ;;  %v4219_v16 = vpop.f32.mrf.mxu0  ;;  %v571_v24 = vadd.f32 %v4836_v40, %v570_v20  ;;  %705 = vst.msk [vmem:[#allocation2 + $0x15a] sm:$0xff] %vm617_vm3, %v610_v19  ;;  %v615_v29 = vmax.f32 %v579_v23, 0.0  ;;  %v740_v50 = vld [vmem:[#allocation2 + $0xa8] sm:$0xff]  ;;  %v4963_v6 = vpack.c.bf16 %v1040_v57, %v1039_v56  ;;  %v1042_v20 = vld [vmem:[#allocation2 + $0x112] sm:$0xff]  ;;  %v5027_v57 = vld [vmem:[%s5976_s4 + $0x1] ss:$0 sm:$0xff] }
  0xef   : > { %694 = vst.msk [vmem:[#allocation2 + $0xda] sm:$0xff] %vm617_vm3, %v599_v10  ;;  %v597_v21 = vmax.f32 %v507_v11, 0.0  ;;  %v518_v22 = vadd.f32 %v4219_v16, %v4836_v40  ;;  %4246 = vmatprep.mubr.msk.bf16.mxu1 %vm617_vm3, %v4909_v12  ;;  %v4235_v26 = vpop.f32.mrf.mxu1  ;;  %v1033_v51 = vld [vmem:[#allocation2 + $0xaa] sm:$0xff]  ;;  %v750_v10 = vld [vmem:[#allocation2 + $0x120] sm:$0xff] }
  0xf0   : > { %4280 = vmatprep.mubr.msk.bf16.mxu0 %vm617_vm3, %v4911_v13  ;;  %v509_v25 = vpop.f32.mrf.mxu0  ;;  %4247 = vmatmul.mubr.msk.bf16.gmra.mxu1 %vm617_vm3, %v4913_v17  ;;  %v613_v30 = vmax.f32 %v571_v24, 0.0  ;;  %v582_v31 = vadd.f32 %v4235_v26, %v4836_v40  ;;  %v738_v34 = vld [vmem:[#allocation2 + $0x90] sm:$0xff]  ;;  %710 = vst.msk [vmem:[#allocation2 + $0x19a] sm:$0xff] %vm617_vm3, %v615_v29  ;;  %v748_v9 = vld [vmem:[#allocation2 + $0x108] sm:$0xff] }
  0xf1   : > { %4281 = vmatmul.mubr.msk.bf16.gmra.mxu0 %vm617_vm3, %v4915_v18  ;;  %692 = vst.msk [vmem:[#allocation2 + $0xc2] sm:$0xff] %vm617_vm3, %v597_v21  ;;  %v600_v27 = vmax.f32 %v518_v22, 0.0  ;;  %v510_v28 = vadd.f32 %v4836_v40, %v509_v25  ;;  %v573_v32 = vpop.f32.mrf.mxu1  ;;  %v1031_v43 = vld [vmem:[#allocation2 + $0x92] sm:$0xff]  ;;  %v751_v11 = vld [vmem:[#allocation2 + $0x128] sm:$0xff] }
  0xf2   : > { %v741_v35 = vld [vmem:[#allocation2 + $0xb0] sm:$0xff]  ;;  %708 = vst.msk [vmem:[#allocation2 + $0x182] sm:$0xff] %vm617_vm3, %v613_v30  ;;  %v574_v41 = vadd.f32 %v4836_v40, %v573_v32  ;;  %v616_v47 = vmax.f32 %v582_v31, 0.0  ;;  %v4981_v21 = vpack.c.bf16 %v751_v11, %v750_v10  ;;  %v752_v25 = vld [vmem:[#allocation2 + $0x138] sm:$0xff]  ;;  %v753_v30 = vld [vmem:[#allocation2 + $0x140] sm:$0xff] }
  0xf3   : > { %695 = vst.msk [vmem:[#allocation2 + $0xe2] sm:$0xff] %vm617_vm3, %v600_v27  ;;  %v598_v33 = vmax.f32 %v510_v28, 0.0  ;;  %v1034_v36 = vld [vmem:[#allocation2 + $0xb2] sm:$0xff]  ;;  %v4943_v53 = vpack.c.bf16 %v741_v35, %v740_v50  ;;  %v1044_v15 = vld [vmem:[#allocation2 + $0x12a] sm:$0xff]  ;;  %v1045_v31 = vld [vmem:[#allocation2 + $0x13a] sm:$0xff]  ;;  %v5001_v35 = vpack.c.bf16 %v753_v30, %v752_v25 }
  0xf4   : > { %v739_v42 = vld [vmem:[#allocation2 + $0x98] sm:$0xff]  ;;  %v614_v52 = vmax.f32 %v574_v41, 0.0  ;;  %v4945_v54 = vpack.c.bf16 %v1034_v36, %v1033_v51  ;;  %711 = vst.msk [vmem:[#allocation2 + $0x1a2] sm:$0xff] %vm617_vm3, %v616_v47  ;;  %v746_v40 = vld [vmem:[#allocation2 + $0xf0] sm:$0xff]  ;;  %v4983_v22 = vpack.c.bf16 %v1044_v15, %v1043_v14  ;;  %v1046_v32 = vld [vmem:[#allocation2 + $0x142] sm:$0xff]  ;;  %v2284_v15 = vsel %vm822_vm1, %v4851_v60, 0 }
  0xf5   : > { %v1032_v46 = vld [vmem:[#allocation2 + $0x9a] sm:$0xff]  ;;  %693 = vst.msk [vmem:[#allocation2 + $0xca] sm:$0xff] %vm617_vm3, %v598_v33  ;;  %v4939_v48 = vpack.c.bf16 %v739_v42, %v738_v34  ;;  %v4961_v5 = vpack.c.bf16 %v747_v55, %v746_v40  ;;  %v749_v16 = vld [vmem:[#allocation2 + $0x110] sm:$0xff]  ;;  %v5003_v36 = vpack.c.bf16 %v1046_v32, %v1045_v31  ;;  %v756_v41 = vld [vmem:[#allocation2 + $0x168] sm:$0xff] }
  0xf6   : > { %v4941_v49 = vpack.c.bf16 %v1032_v46, %v1031_v43  ;;  %709 = vst.msk [vmem:[#allocation2 + $0x18a] sm:$0xff] %vm617_vm3, %v614_v52  ;;  %v744_v3 = vld [vmem:[#allocation2 + $0xd8] sm:$0xff]  ;;  %v1041_v19 = vld [vmem:[#allocation2 + $0x10a] sm:$0xff]  ;;  %v4985_v23 = vpack.c.bf16 %v749_v16, %v748_v9  ;;  %v1992_v9 = vsel %vm822_vm1, %v4829_v39, 0 }
  0xf7   : > { %4250 = vmatprep.mubr.msk.bf16.mxu1 %vm617_vm3, %v4939_v48  ;;  %v1037_v4 = vld [vmem:[#allocation2 + $0xda] sm:$0xff]  ;;  %v4987_v24 = vpack.c.bf16 %v1042_v20, %v1041_v19  ;;  %v754_v26 = vld [vmem:[#allocation2 + $0x150] sm:$0xff]  ;;  %v1311_v42 = vld [vmem:[#allocation2 + $0x4] sm:$0xff] }
  0xf8   : > { %4284 = vmatprep.mubr.msk.bf16.mxu0 %vm617_vm3, %v4941_v49  ;;  %4251 = vmatmul.mubr.msk.bf16.gmra.mxu1 %vm617_vm3, %v4943_v53  ;;  %v742_v58 = vld [vmem:[#allocation2 + $0xc0] sm:$0xff]  ;;  %v755_v27 = vld [vmem:[#allocation2 + $0x158] sm:$0xff]  ;;  %v1312_v43 = vld [vmem:[#allocation2 + $0xc] sm:$0xff] }
  0xf9   : > { %4285 = vmatmul.mubr.msk.bf16.gmra.mxu0 %vm617_vm3, %v4945_v54  ;;  %v1035_v63 = vld [vmem:[#allocation2 + $0xc2] sm:$0xff]  ;;  %v1047_v28 = vld [vmem:[#allocation2 + $0x152] sm:$0xff]  ;;  %v1048_v29 = vld [vmem:[#allocation2 + $0x15a] sm:$0xff]  ;;  %v4997_v33 = vpack.c.bf16 %v755_v27, %v754_v26  ;;  %v1343_v51 = vpack.c.bf16 %v1312_v43, %v1311_v42 }
  0xfa   : > { %v745_v59 = vld [vmem:[#allocation2 + $0xe0] sm:$0xff]  ;;  %v4999_v34 = vpack.c.bf16 %v1048_v29, %v1047_v28  ;;  %v757_v46 = vld [vmem:[#allocation2 + $0x170] sm:$0xff]  ;;  %v5048_v39 = vld [vmem:[%s5974_s2 + $0xc] sm:$0x3] }
  0xfb   : > { %v1038_v61 = vld [vmem:[#allocation2 + $0xe2] sm:$0xff]  ;;  %v4965_v7 = vpack.c.bf16 %v745_v59, %v744_v3  ;;  %v1049_v47 = vld [vmem:[#allocation2 + $0x16a] sm:$0xff]  ;;  %v1050_v50 = vld [vmem:[#allocation2 + $0x172] sm:$0xff]  ;;  %v5013_v52 = vpack.c.bf16 %v757_v46, %v756_v41  ;;  %v4274_v3 = vpop.f32.mrf.mxu0 }
  0xfc   : > { %v743_v62 = vld [vmem:[#allocation2 + $0xc8] sm:$0xff]  ;;  %v4967_v8 = vpack.c.bf16 %v1038_v61, %v1037_v4  ;;  %v5015_v40 = vpack.c.bf16 %v1050_v50, %v1049_v47  ;;  %v1313_v55 = vld [vmem:[#allocation2 + $0x1c] sm:$0xff]  ;;  %v1318_v26 = vld [vmem:[#allocation2 + $0x54] sm:$0xff] }
  0xfd   : > { %v1036_v0 = vld [vmem:[#allocation2 + $0xca] sm:$0xff]  ;;  %v4957_v1 = vpack.c.bf16 %v743_v62, %v742_v58  ;;  %v4240_v58 = vpop.f32.mrf.mxu1  ;;  %v1315_v62 = vld [vmem:[#allocation2 + $0x34] sm:$0xff]  ;;  %v1152_v11 = vpop.f32.mrf.mxu0  ;;  %v1321_v31 = vld [vmem:[#allocation2 + $0x7c] sm:$0xff] }
  0xfe   : > { %v4959_v2 = vpack.c.bf16 %v1036_v0, %v1035_v63  ;;  %v1314_v56 = vld [vmem:[#allocation2 + $0x24] sm:$0xff]  ;;  %v989_v59 = vadd.f32 %v4240_v58, %v5027_v57  ;;  %v1316_v63 = vld [vmem:[#allocation2 + $0x3c] sm:$0xff]  ;;  %v5053_v20 = vld [vmem:[%s5974_s2 + $0xe] sm:$0x3] }
  0xff   : > { %4254 = vmatprep.mubr.msk.bf16.mxu1 %vm617_vm3, %v4957_v1  ;;  %v1344_v61 = vpack.c.bf16 %v1314_v56, %v1313_v55  ;;  %v860_v0 = vpop.f32.mrf.mxu1  ;;  %v5035_v14 = vpack.c.bf16 %v1316_v63, %v1315_v62  ;;  %v4275_v60 = vpop.f32.mrf.mxu0  ;;  %v1319_v27 = vld [vmem:[#allocation2 + $0x64] sm:$0xff]  ;;  %v1320_v28 = vld [vmem:[#allocation2 + $0x6c] sm:$0xff]  ;;  %v1323_v41 = vld [vmem:[#allocation2 + $0x94] sm:$0xff] }
 0x100   : > { %4288 = vmatprep.mubr.msk.bf16.mxu0 %vm617_vm3, %v4959_v2  ;;  %4255 = vmatmul.mubr.msk.bf16.gmra.mxu1 %vm617_vm3, %v4965_v7  ;;  %v987_v4 = vadd.f32 %v5027_v57, %v860_v0  ;;  %v5067_v30 = vpack.c.bf16 %v1320_v28, %v1319_v27  ;;  %v1322_v32 = vld [vmem:[#allocation2 + $0x84] sm:$0xff]  ;;  %v1324_v42 = vld [vmem:[#allocation2 + $0x9c] sm:$0xff]  ;;  %v1325_v47 = vld [vmem:[#allocation2 + $0xac] sm:$0xff] }
 0x101   : > { %4289 = vmatmul.mubr.msk.bf16.gmra.mxu0 %vm617_vm3, %v4967_v8  ;;  %4258 = vmatprep.mubr.msk.bf16.mxu1 %vm617_vm3, %v4961_v5  ;;  %v4241_v10 = vpop.f32.mrf.mxu1  ;;  %v5077_v43 = vpack.c.bf16 %v1322_v32, %v1321_v31  ;;  %v5079_v46 = vpack.c.bf16 %v1324_v42, %v1323_v41  ;;  %v1326_v50 = vld [vmem:[#allocation2 + $0xb4] sm:$0xff]  ;;  %v1328_v55 = vld [vmem:[#allocation2 + $0xcc] sm:$0xff]  ;;  %v1332_v63 = vld [vmem:[#allocation2 + $0xfc] sm:$0xff] }
 0x102   : > { %4292 = vmatprep.mubr.msk.bf16.mxu0 %vm617_vm3, %v4963_v6  ;;  %v990_v16 = vadd.f32 %v4241_v10, %v5027_v57  ;;  %v5040_v19 = vadd.f32 %v1152_v11, %v987_v4  ;;  %v5089_v56 = vpack.c.bf16 %v1326_v50, %v1325_v47  ;;  %v1331_v62 = vld [vmem:[#allocation2 + $0xf4] sm:$0xff]  ;;  %v1333_v4 = vld [vmem:[#allocation2 + $0x10c] sm:$0xff]  ;;  %v1335_v10 = vld [vmem:[#allocation2 + $0x124] sm:$0xff] }
 0x103   : > { %v1336_v11 = vld [vmem:[#allocation2 + $0x12c] sm:$0xff]  ;;  %v1338_v27 = vld [vmem:[#allocation2 + $0x144] sm:$0xff]  ;;  %v1339_v28 = vld [vmem:[#allocation2 + $0x154] sm:$0xff] }
 0x104   : > { %v5057_v25 = vadd.f32 %v4275_v60, %v990_v16  ;;  %v1355_v16 = vpack.c.bf16 %v1336_v11, %v1335_v10  ;;  %v1631_v60 = vld [vmem:[#allocation2 + $0x180] sm:$0xff]  ;;  %v1633_v47 = vld [vmem:[#allocation2 + $0x198] sm:$0xff]  ;;  %v5212_v11 = vpop.f32.mrf.mxu1 }
 0x105   : > { %v1340_v31 = vld [vmem:[#allocation2 + $0x15c] sm:$0xff] }
 0x106   : > { %v1357_v42 = vpack.c.bf16 %v1340_v31, %v1339_v28  ;;  %v1634_v50 = vld [vmem:[#allocation2 + $0x1a0] sm:$0xff] }
 0x108   : > { %4259 = vmatmul.mubr.msk.bf16.gmra.mxu1 %vm617_vm3, %v4985_v23 }
 0x109   : > { %4293 = vmatmul.mubr.msk.bf16.gmra.mxu0 %vm617_vm3, %v4987_v24  ;;  %4262 = vmatprep.mubr.msk.bf16.mxu1 %vm617_vm3, %v4981_v21 }
 0x10a   : > { %4296 = vmatprep.mubr.msk.bf16.mxu0 %vm617_vm3, %v4983_v22 }
 0x110   : > { %4263 = vmatmul.mubr.msk.bf16.gmra.mxu1 %vm617_vm3, %v5001_v35 }
 0x111   : > { %4297 = vmatmul.mubr.msk.bf16.gmra.mxu0 %vm617_vm3, %v5003_v36  ;;  %4266 = vmatprep.mubr.msk.bf16.mxu1 %vm617_vm3, %v4997_v33 }
 0x112   : > { %4300 = vmatprep.mubr.msk.bf16.mxu0 %vm617_vm3, %v4999_v34 }
 0x118   : > { %4267 = vmatmul.mubr.msk.bf16.gmra.mxu1 %vm617_vm3, %v5013_v52 }
 0x119   : > { %4301 = vmatmul.mubr.msk.bf16.gmra.mxu0 %vm617_vm3, %v5015_v40  ;;  %4306 = vmatprep.mubr.msk.bf16.mxu1 %vm617_vm3, %v1343_v51  ;;  %v1327_v51 = vld [vmem:[#allocation2 + $0xc4] sm:$0xff] }
 0x11a   : > { %4340 = vmatprep.mubr.msk.bf16.mxu0 %vm617_vm3, %v4877_v37  ;;  %v5031_v37 = vadd.f32 %v4274_v3, %v989_v59  ;;  %v5091_v58 = vpack.c.bf16 %v1328_v55, %v1327_v51  ;;  %v1329_v59 = vld [vmem:[#allocation2 + $0xdc] sm:$0xff]  ;;  %v1353_v3 = vpack.c.bf16 %v1332_v63, %v1331_v62  ;;  %v1341_v51 = vld [vmem:[#allocation2 + $0x16c] sm:$0xff]  ;;  %v1342_v55 = vld [vmem:[#allocation2 + $0x174] sm:$0xff]  ;;  %v2577_v62 = vsel %vm822_vm1, %v5048_v39, 0 }
 0x11b   : > { %v2869_v63 = vsel %vm822_vm1, %v5053_v20, 0 }
 0x120   : > { %4307 = vmatmul.mubr.msk.bf16.vlgmr.msra.gmra.mxu1 %vm617_vm3, %v1344_v61  ;;  %v1330_v61 = vld [vmem:[#allocation2 + $0xe4] sm:$0xff] }
 0x121   : > { %4341 = vmatmul.mubr.msk.bf16.vlgmr.msra.gmra.mxu0 %vm617_vm3, %v4881_v44  ;;  %4373 = vmatpush3.bf16.msra.mxu1 %v1992_v9  ;;  %v1317_v44 = vld [vmem:[#allocation2 + $0x4c] sm:$0xff]  ;;  %v1352_v0 = vpack.c.bf16 %v1330_v61, %v1329_v59  ;;  %v1334_v9 = vld [vmem:[#allocation2 + $0x114] sm:$0xff]  ;;  %v5121_v59 = vpack.c.bf16 %v1634_v50, %v1633_v47  ;;  %v1358_v61 = vpack.c.bf16 %v1342_v55, %v1341_v51 }
 0x122   : > { %4310 = vmatprep.mubr.msk.bf16.mxu1 %vm617_vm3, %v5035_v14  ;;  %4344 = vmatprep.mubr.msk.bf16.mxu0 %vm617_vm3, %v4909_v12  ;;  %v5065_v29 = vpack.c.bf16 %v1318_v26, %v1317_v44  ;;  %v1632_v44 = vld [vmem:[#allocation2 + $0x188] sm:$0xff]  ;;  %v1337_v26 = vld [vmem:[#allocation2 + $0x13c] sm:$0xff] }
 0x123   : > { %4407 = vmatpush3.bf16.msra.mxu0 %v2284_v15  ;;  %4586 = vmatprep.subr.msk.bf16.mxu1 %vm822_vm1, %v5048_v39  ;;  %v1354_v15 = vpack.c.bf16 %v1334_v9, %v1333_v4  ;;  %v5113_v32 = vpack.c.bf16 %v1632_v44, %v1631_v60  ;;  %v1356_v41 = vpack.c.bf16 %v1338_v27, %v1337_v26  ;;  %v720_v4 = vld [vmem:[%s5974_s2 + $0x10] sm:$0x3] }
 0x124   : > { %4587 = vmatprep.subr.msk.bf16.mxu0 %vm822_vm1, %v5053_v20  ;;  %v2216_v39 = vld [vmem:[#allocation2 + $0x18c] sm:$0xff]  ;;  %v3161_v10 = vsel %vm822_vm1, %v720_v4, 0 }
 0x128   : > { %4311 = vmatmul.mubr.msk.bf16.gmra.mxu1 %vm617_vm3, %v5065_v29 }
 0x129   : > { %4345 = vmatmul.mubr.msk.bf16.gmra.mxu0 %vm617_vm3, %v4913_v17  ;;  %4314 = vmatprep.mubr.msk.bf16.mxu1 %vm617_vm3, %v5067_v30 }
 0x12a   : > { %4348 = vmatprep.mubr.msk.bf16.mxu0 %vm617_vm3, %v4939_v48 }
 0x130   : > { %4315 = vmatmul.mubr.msk.bf16.gmra.mxu1 %vm617_vm3, %v5077_v43 }
 0x131   : > { %4349 = vmatmul.mubr.msk.bf16.gmra.mxu0 %vm617_vm3, %v4943_v53  ;;  %4318 = vmatprep.mubr.msk.bf16.mxu1 %vm617_vm3, %v5079_v46 }
 0x132   : > { %4352 = vmatprep.mubr.msk.bf16.mxu0 %vm617_vm3, %v4957_v1 }
 0x138   : > { %4319 = vmatmul.mubr.msk.bf16.gmra.mxu1 %vm617_vm3, %v5089_v56 }
 0x139   : > { %4353 = vmatmul.mubr.msk.bf16.gmra.mxu0 %vm617_vm3, %v4965_v7  ;;  %4322 = vmatprep.mubr.msk.bf16.mxu1 %vm617_vm3, %v5091_v58 }
 0x13a   : > { %4356 = vmatprep.mubr.msk.bf16.mxu0 %vm617_vm3, %v4961_v5 }
 0x140   : > { %4323 = vmatmul.mubr.msk.bf16.gmra.mxu1 %vm617_vm3, %v1352_v0 }
 0x141   : > { %4357 = vmatmul.mubr.msk.bf16.gmra.mxu0 %vm617_vm3, %v4985_v23  ;;  %4326 = vmatprep.mubr.msk.bf16.mxu1 %vm617_vm3, %v1353_v3 }
 0x142   : > { %4360 = vmatprep.mubr.msk.bf16.mxu0 %vm617_vm3, %v4981_v21 }
 0x148   : > { %4327 = vmatmul.mubr.msk.bf16.gmra.mxu1 %vm617_vm3, %v1354_v15 }
 0x149   : > { %4361 = vmatmul.mubr.msk.bf16.gmra.mxu0 %vm617_vm3, %v5001_v35  ;;  %4330 = vmatprep.mubr.msk.bf16.mxu1 %vm617_vm3, %v1355_v16 }
 0x14a   : > { %4364 = vmatprep.mubr.msk.bf16.mxu0 %vm617_vm3, %v4997_v33 }
 0x150   : > { %4331 = vmatmul.mubr.msk.bf16.gmra.mxu1 %vm617_vm3, %v1356_v41 }
 0x151   : > { %4365 = vmatmul.mubr.msk.bf16.gmra.mxu0 %vm617_vm3, %v5013_v52  ;;  %4334 = vmatprep.mubr.msk.bf16.mxu1 %vm617_vm3, %v1357_v42 }
 0x152   : > { %4368 = vmatprep.mubr.msk.bf16.mxu0 %vm617_vm3, %v5113_v32 }
 0x158   : > { %4335 = vmatmul.mubr.msk.bf16.gmra.mxu1 %vm617_vm3, %v1358_v61 }
 0x159   : > { %4369 = vmatmul.mubr.msk.bf16.gmra.mxu0 %vm617_vm3, %v5121_v59  ;;  %4374 = vmatprep.mubr.msk.bf16.mxu1 %vm617_vm3, %v4879_v38  ;;  %v1923_v38 = vld [vmem:[#allocation2 + $0x182] sm:$0xff] }
 0x15a   : > { %4408 = vmatprep.mubr.msk.bf16.mxu0 %vm617_vm3, %v5035_v14  ;;  %v2215_v14 = vld [vmem:[#allocation2 + $0x184] sm:$0xff] }
 0x160   : > { %4375 = vmatmul.mubr.msk.bf16.vlgmr.msra.gmra.mxu1 %vm617_vm3, %v4883_v45  ;;  %v1924_v45 = vld [vmem:[#allocation2 + $0x18a] sm:$0xff] }
 0x161   : > { %4409 = vmatmul.mubr.msk.bf16.vlgmr.msra.gmra.mxu0 %vm617_vm3, %v5065_v29  ;;  %4441 = vmatpush3.bf16.msra.mxu1 %v2577_v62  ;;  %v5180_v20 = vpack.c.bf16 %v1924_v45, %v1923_v38  ;;  %v5182_v29 = vpack.c.bf16 %v2216_v39, %v2215_v14 }
 0x162   : > { %4378 = vmatprep.mubr.msk.bf16.mxu1 %vm617_vm3, %v4911_v13  ;;  %4412 = vmatprep.mubr.msk.bf16.mxu0 %vm617_vm3, %v5067_v30 }
 0x163   : > { %4475 = vmatpush3.bf16.msra.mxu0 %v2869_v63  ;;  %4588 = vmatprep.subr.msk.bf16.mxu1 %vm822_vm1, %v720_v4 }
 0x168   : > { %4379 = vmatmul.mubr.msk.bf16.gmra.mxu1 %vm617_vm3, %v4915_v18 }
 0x169   : > { %4413 = vmatmul.mubr.msk.bf16.gmra.mxu0 %vm617_vm3, %v5077_v43  ;;  %4382 = vmatprep.mubr.msk.bf16.mxu1 %vm617_vm3, %v4941_v49  ;;  %v1925_v43 = vld [vmem:[#allocation2 + $0x19a] sm:$0xff] }
 0x16a   : > { %4416 = vmatprep.mubr.msk.bf16.mxu0 %vm617_vm3, %v5079_v46 }
 0x170   : > { %4383 = vmatmul.mubr.msk.bf16.gmra.mxu1 %vm617_vm3, %v4945_v54 }
 0x171   : > { %4417 = vmatmul.mubr.msk.bf16.gmra.mxu0 %vm617_vm3, %v5089_v56  ;;  %4386 = vmatprep.mubr.msk.bf16.mxu1 %vm617_vm3, %v4959_v2  ;;  %v1926_v56 = vld [vmem:[#allocation2 + $0x1a2] sm:$0xff] }
 0x172   : > { %4420 = vmatprep.mubr.msk.bf16.mxu0 %vm617_vm3, %v5091_v58  ;;  %v2217_v58 = vld [vmem:[#allocation2 + $0x19c] sm:$0xff] }
 0x178   : > { %4387 = vmatmul.mubr.msk.bf16.gmra.mxu1 %vm617_vm3, %v4967_v8 }
 0x179   : > { %4421 = vmatmul.mubr.msk.bf16.gmra.mxu0 %vm617_vm3, %v1352_v0  ;;  %4390 = vmatprep.mubr.msk.bf16.mxu1 %vm617_vm3, %v4963_v6  ;;  %v2218_v0 = vld [vmem:[#allocation2 + $0x1a4] sm:$0xff] }
 0x17a   : > { %4424 = vmatprep.mubr.msk.bf16.mxu0 %vm617_vm3, %v1353_v3  ;;  %v5191_v3 = vpack.c.bf16 %v1926_v56, %v1925_v43  ;;  %v5193_v9 = vpack.c.bf16 %v2218_v0, %v2217_v58 }
 0x180   : > { %4391 = vmatmul.mubr.msk.bf16.gmra.mxu1 %vm617_vm3, %v4987_v24 }
 0x181   : > { %4425 = vmatmul.mubr.msk.bf16.gmra.mxu0 %vm617_vm3, %v1354_v15  ;;  %4394 = vmatprep.mubr.msk.bf16.mxu1 %vm617_vm3, %v4983_v22 }
 0x182   : > { %4428 = vmatprep.mubr.msk.bf16.mxu0 %vm617_vm3, %v1355_v16 }
 0x188   : > { %4395 = vmatmul.mubr.msk.bf16.gmra.mxu1 %vm617_vm3, %v5003_v36 }
 0x189   : > { %4429 = vmatmul.mubr.msk.bf16.gmra.mxu0 %vm617_vm3, %v1356_v41  ;;  %4398 = vmatprep.mubr.msk.bf16.mxu1 %vm617_vm3, %v4999_v34 }
 0x18a   : > { %4432 = vmatprep.mubr.msk.bf16.mxu0 %vm617_vm3, %v1357_v42 }
 0x190   : > { %4399 = vmatmul.mubr.msk.bf16.gmra.mxu1 %vm617_vm3, %v5015_v40 }
 0x191   : > { %4433 = vmatmul.mubr.msk.bf16.gmra.mxu0 %vm617_vm3, %v1358_v61  ;;  %4402 = vmatprep.mubr.msk.bf16.mxu1 %vm617_vm3, %v5180_v20 }
 0x192   : > { %4436 = vmatprep.mubr.msk.bf16.mxu0 %vm617_vm3, %v5182_v29 }
 0x198   : > { %4403 = vmatmul.mubr.msk.bf16.gmra.mxu1 %vm617_vm3, %v5191_v3 }
 0x199   : > { %4437 = vmatmul.mubr.msk.bf16.gmra.mxu0 %vm617_vm3, %v5193_v9  ;;  %4442 = vmatprep.mubr.msk.bf16.mxu1 %vm617_vm3, %v4909_v12  ;;  %v5214_v12 = vpop.f32.mrf.mxu0 }
 0x19a   : > { %4476 = vmatprep.mubr.msk.bf16.mxu0 %vm617_vm3, %v4911_v13 }
 0x1a0   : > { %4443 = vmatmul.mubr.msk.bf16.vlgmr.msra.gmra.mxu1 %vm617_vm3, %v4913_v17 }
 0x1a1   : > { %4477 = vmatmul.mubr.msk.bf16.vlgmr.msra.gmra.mxu0 %vm617_vm3, %v4915_v18  ;;  %4509 = vmatpush3.bf16.msra.mxu1 %v3161_v10 }
 0x1a2   : > { %4446 = vmatprep.mubr.msk.bf16.mxu1 %vm617_vm3, %v4939_v48  ;;  %4480 = vmatprep.mubr.msk.bf16.mxu0 %vm617_vm3, %v4941_v49 }
 0x1a8   : > { %v4244_v13 = vpop.f32.mrf.mxu1  ;;  %4447 = vmatmul.mubr.msk.bf16.gmra.mxu1 %vm617_vm3, %v4943_v53 }
 0x1a9   : > { %v4278_v15 = vpop.f32.mrf.mxu0  ;;  %4481 = vmatmul.mubr.msk.bf16.gmra.mxu0 %vm617_vm3, %v4945_v54  ;;  %v993_v17 = vadd.f32 %v4244_v13, %v5027_v57  ;;  %4450 = vmatprep.mubr.msk.bf16.mxu1 %vm617_vm3, %v4957_v1 }
 0x1aa   : > { %4484 = vmatprep.mubr.msk.bf16.mxu0 %vm617_vm3, %v4959_v2  ;;  %v876_v18 = vpop.f32.mrf.mxu1 }
 0x1ab   : > { %v1168_v48 = vpop.f32.mrf.mxu0  ;;  %v5225_v49 = vadd.f32 %v4278_v15, %v993_v17  ;;  %v991_v16 = vadd.f32 %v5027_v57, %v876_v18 }
 0x1ac   : > { %v4245_v60 = vpop.f32.mrf.mxu1 }
 0x1ad   : > { %v4279_v44 = vpop.f32.mrf.mxu0  ;;  %v5228_v53 = vadd.f32 %v1168_v48, %v991_v16  ;;  %v994_v54 = vadd.f32 %v4245_v60, %v5027_v57 }
 0x1ae   : > { %v879_v26 = vpop.f32.mrf.mxu1 }
 0x1af   : > { %v1171_v27 = vpop.f32.mrf.mxu0  ;;  %v5231_v28 = vadd.f32 %v4279_v44, %v994_v54  ;;  %v992_v1 = vadd.f32 %v5027_v57, %v879_v26 }
 0x1b0   : > { %v4248_v31 = vpop.f32.mrf.mxu1  ;;  %4451 = vmatmul.mubr.msk.bf16.gmra.mxu1 %vm617_vm3, %v4965_v7 }
 0x1b1   : > { %v4282_v2 = vpop.f32.mrf.mxu0  ;;  %4485 = vmatmul.mubr.msk.bf16.gmra.mxu0 %vm617_vm3, %v4967_v8  ;;  %v5238_v41 = vadd.f32 %v1171_v27, %v992_v1  ;;  %v997_v42 = vadd.f32 %v4248_v31, %v5027_v57  ;;  %4454 = vmatprep.mubr.msk.bf16.mxu1 %vm617_vm3, %v4961_v5 }
 0x1b2   : > { %4488 = vmatprep.mubr.msk.bf16.mxu0 %vm617_vm3, %v4963_v6  ;;  %v892_v47 = vpop.f32.mrf.mxu1 }
 0x1b3   : > { %v1184_v50 = vpop.f32.mrf.mxu0  ;;  %v5245_v51 = vadd.f32 %v4282_v2, %v997_v42  ;;  %v995_v55 = vadd.f32 %v5027_v57, %v892_v47 }
 0x1b4   : > { %v4249_v7 = vpop.f32.mrf.mxu1 }
 0x1b5   : > { %v4283_v61 = vpop.f32.mrf.mxu0  ;;  %v5248_v62 = vadd.f32 %v1184_v50, %v995_v55  ;;  %v998_v8 = vadd.f32 %v4249_v7, %v5027_v57  ;;  %v2508_v55 = vld [vmem:[#allocation2 + $0x1b0] sm:$0xff] }
 0x1b6   : > { %v895_v63 = vpop.f32.mrf.mxu1 }
 0x1b7   : > { %v1187_v4 = vpop.f32.mrf.mxu0  ;;  %v5251_v38 = vadd.f32 %v4283_v61, %v998_v8  ;;  %v996_v5 = vadd.f32 %v5027_v57, %v895_v63  ;;  %v2509_v8 = vld [vmem:[#allocation2 + $0x1b8] sm:$0xff] }
 0x1b8   : > { %v4252_v45 = vpop.f32.mrf.mxu1  ;;  %4455 = vmatmul.mubr.msk.bf16.gmra.mxu1 %vm617_vm3, %v4985_v23  ;;  %v2800_v63 = vld [vmem:[#allocation2 + $0x1b2] sm:$0xff] }
 0x1b9   : > { %v4286_v6 = vpop.f32.mrf.mxu0  ;;  %4489 = vmatmul.mubr.msk.bf16.gmra.mxu0 %vm617_vm3, %v4987_v24  ;;  %v5258_v14 = vadd.f32 %v1187_v4, %v996_v5  ;;  %v1001_v39 = vadd.f32 %v4252_v45, %v5027_v57  ;;  %4458 = vmatprep.mubr.msk.bf16.mxu1 %vm617_vm3, %v4981_v21  ;;  %v2801_v4 = vld [vmem:[#allocation2 + $0x1ba] sm:$0xff] }
 0x1ba   : > { %4492 = vmatprep.mubr.msk.bf16.mxu0 %vm617_vm3, %v4983_v22  ;;  %v908_v43 = vpop.f32.mrf.mxu1 }
 0x1bb   : > { %v1200_v56 = vpop.f32.mrf.mxu0  ;;  %v5265_v58 = vadd.f32 %v4286_v6, %v1001_v39  ;;  %v999_v0 = vadd.f32 %v5027_v57, %v908_v43  ;;  %v2818_v43 = vpack.c.bf16 %v2801_v4, %v2800_v63 }
 0x1bc   : > { %v4253_v23 = vpop.f32.mrf.mxu1 }
 0x1bd   : > { %v4287_v10 = vpop.f32.mrf.mxu0  ;;  %v5268_v13 = vadd.f32 %v1200_v56, %v999_v0  ;;  %v1002_v24 = vadd.f32 %v4253_v23, %v5027_v57 }
 0x1be   : > { %v911_v15 = vpop.f32.mrf.mxu1 }
 0x1bf   : > { %v1203_v17 = vpop.f32.mrf.mxu0  ;;  %v5271_v18 = vadd.f32 %v4287_v10, %v1002_v24  ;;  %v1000_v21 = vadd.f32 %v5027_v57, %v911_v15  ;;  %v2510_v24 = vld [vmem:[#allocation2 + $0x1c8] sm:$0xff] }
 0x1c0   : > { %v4256_v48 = vpop.f32.mrf.mxu1  ;;  %4459 = vmatmul.mubr.msk.bf16.gmra.mxu1 %vm617_vm3, %v5001_v35 }
 0x1c1   : > { %v4290_v22 = vpop.f32.mrf.mxu0  ;;  %4493 = vmatmul.mubr.msk.bf16.gmra.mxu0 %vm617_vm3, %v5003_v36  ;;  %v5278_v16 = vadd.f32 %v1203_v17, %v1000_v21  ;;  %v1005_v60 = vadd.f32 %v4256_v48, %v5027_v57  ;;  %4462 = vmatprep.mubr.msk.bf16.mxu1 %vm617_vm3, %v4997_v33  ;;  %v2511_v17 = vld [vmem:[#allocation2 + $0x1d0] sm:$0xff] }
 0x1c2   : > { %4496 = vmatprep.mubr.msk.bf16.mxu0 %vm617_vm3, %v4999_v34  ;;  %v924_v44 = vpop.f32.mrf.mxu1  ;;  %v2802_v21 = vld [vmem:[#allocation2 + $0x1ca] sm:$0xff]  ;;  %v2803_v48 = vld [vmem:[#allocation2 + $0x1d2] sm:$0xff] }
 0x1c3   : > { %v1216_v54 = vpop.f32.mrf.mxu0  ;;  %v5285_v26 = vadd.f32 %v4290_v22, %v1005_v60  ;;  %v1003_v27 = vadd.f32 %v5027_v57, %v924_v44 }
 0x1c4   : > { %v4257_v35 = vpop.f32.mrf.mxu1 }
 0x1c5   : > { %v4291_v1 = vpop.f32.mrf.mxu0  ;;  %v5288_v31 = vadd.f32 %v1216_v54, %v1003_v27  ;;  %v1006_v36 = vadd.f32 %v4257_v35, %v5027_v57  ;;  %v2527_v35 = vpack.c.bf16 %v2511_v17, %v2510_v24 }
 0x1c6   : > { %v5291_v2 = vpop.f32.mrf.mxu1 }
 0x1c7   : > { %v5293_v42 = vpop.f32.mrf.mxu0  ;;  %v5295_v33 = vadd.f32 %v4291_v1, %v1006_v36 }
 0x1c8   : > { %v4260_v47 = vpop.f32.mrf.mxu1  ;;  %4463 = vmatmul.mubr.msk.bf16.gmra.mxu1 %vm617_vm3, %v5013_v52 }
 0x1c9   : > { %v4294_v34 = vpop.f32.mrf.mxu0  ;;  %4497 = vmatmul.mubr.msk.bf16.gmra.mxu0 %vm617_vm3, %v5015_v40  ;;  %v1009_v50 = vadd.f32 %v4260_v47, %v5027_v57  ;;  %4466 = vmatprep.mubr.msk.bf16.mxu1 %vm617_vm3, %v5113_v32  ;;  %v2526_v32 = vpack.c.bf16 %v2509_v8, %v2508_v55 }
 0x1ca   : > { %4500 = vmatprep.mubr.msk.bf16.mxu0 %vm617_vm3, %v5180_v20  ;;  %v940_v7 = vpop.f32.mrf.mxu1 }
 0x1cb   : > { %v1232_v61 = vpop.f32.mrf.mxu0  ;;  %v5306_v5 = vadd.f32 %v4294_v34, %v1009_v50  ;;  %v1007_v52 = vadd.f32 %v5027_v57, %v940_v7 }
 0x1cc   : > { %v4261_v45 = vpop.f32.mrf.mxu1 }
 0x1cd   : > { %v4295_v40 = vpop.f32.mrf.mxu0  ;;  %v5309_v6 = vadd.f32 %v1232_v61, %v1007_v52  ;;  %v1010_v39 = vadd.f32 %v4261_v45, %v5027_v57  ;;  %v3066_v45 = vld [vmem:[#allocation2 + $0x7c] sm:$0xff] }
 0x1ce   : > { %v5312_v56 = vpop.f32.mrf.mxu1 }
 0x1cf   : > { %v5314_v20 = vpop.f32.mrf.mxu0  ;;  %v5316_v0 = vadd.f32 %v4295_v40, %v1010_v39  ;;  %v3067_v40 = vld [vmem:[#allocation2 + $0x84] sm:$0xff] }
 0x1d0   : > { %v4264_v23 = vpop.f32.mrf.mxu1  ;;  %4467 = vmatmul.mubr.msk.bf16.gmra.mxu1 %vm617_vm3, %v5121_v59 }
 0x1d1   : > { %v4298_v10 = vpop.f32.mrf.mxu0  ;;  %4501 = vmatmul.mubr.msk.bf16.gmra.mxu0 %vm617_vm3, %v5191_v3  ;;  %v1013_v15 = vadd.f32 %v4264_v23, %v5027_v57  ;;  %4470 = vmatprep.mubr.msk.bf16.mxu1 %vm617_vm3, %v2526_v32  ;;  %v2819_v3 = vpack.c.bf16 %v2803_v48, %v2802_v21 }
 0x1d2   : > { %4504 = vmatprep.mubr.msk.bf16.mxu0 %vm617_vm3, %v2818_v43  ;;  %v956_v22 = vpop.f32.mrf.mxu1 }
 0x1d3   : > { %v1248_v60 = vpop.f32.mrf.mxu0  ;;  %v5325_v44 = vadd.f32 %v4298_v10, %v1013_v15  ;;  %v1011_v54 = vadd.f32 %v5027_v57, %v956_v22  ;;  %v3097_v15 = vpack.c.bf16 %v3067_v40, %v3066_v45 }
 0x1d4   : > { %v4265_v59 = vpop.f32.mrf.mxu1 }
 0x1d5   : > { %v4299_v27 = vpop.f32.mrf.mxu0  ;;  %v5328_v1 = vadd.f32 %v1248_v60, %v1011_v54  ;;  %v1014_v36 = vadd.f32 %v4265_v59, %v5027_v57 }
 0x1d6   : > { %v5331_v47 = vpop.f32.mrf.mxu1 }
 0x1d7   : > { %v5333_v34 = vpop.f32.mrf.mxu0  ;;  %v5335_v50 = vadd.f32 %v4299_v27, %v1014_v36  ;;  %v3070_v27 = vld [vmem:[#allocation2 + $0xac] sm:$0xff] }
 0x1d8   : > { %v4268_v55 = vpop.f32.mrf.mxu1  ;;  %4471 = vmatmul.mubr.msk.bf16.gmra.mxu1 %vm617_vm3, %v2527_v35  ;;  %v3071_v35 = vld [vmem:[#allocation2 + $0xb4] sm:$0xff] }
 0x1d9   : > { %v4302_v7 = vpop.f32.mrf.mxu0  ;;  %4505 = vmatmul.mubr.msk.bf16.gmra.mxu0 %vm617_vm3, %v2819_v3  ;;  %v1017_v61 = vadd.f32 %v4268_v55, %v5027_v57  ;;  %4510 = vmatprep.mubr.msk.bf16.mxu1 %vm617_vm3, %v5067_v30  ;;  %v3072_v55 = vld [vmem:[#allocation2 + $0xc4] sm:$0xff] }
 0x1da   : > { %v972_v8 = vpop.f32.mrf.mxu1 }
 0x1db   : > { %v1264_v63 = vpop.f32.mrf.mxu0  ;;  %v5342_v4 = vadd.f32 %v4302_v7, %v1017_v61  ;;  %v1015_v52 = vadd.f32 %v5027_v57, %v972_v8  ;;  %v3073_v7 = vld [vmem:[#allocation2 + $0xcc] sm:$0xff] }
 0x1dc   : > { %v4269_v39 = vpop.f32.mrf.mxu1  ;;  %v3100_v45 = vpack.c.bf16 %v3073_v7, %v3072_v55 }
 0x1dd   : > { %v4303_v32 = vpop.f32.mrf.mxu0  ;;  %v5345_v43 = vadd.f32 %v1264_v63, %v1015_v52  ;;  %v1018_v23 = vadd.f32 %v4269_v39, %v5027_v57 }
 0x1de   : > { %v5348_v10 = vpop.f32.mrf.mxu1 }
 0x1df   : > { %v5350_v24 = vpop.f32.mrf.mxu0  ;;  %v5352_v30 = vadd.f32 %v4303_v32, %v1018_v23 }
 0x1e0   : > { %v4308_v17 = vpop.f32.mrf.mxu1  ;;  %4511 = vmatmul.mubr.msk.bf16.vlgmr.msra.gmra.mxu1 %vm617_vm3, %v3097_v15 }
 0x1e1   : > { %v4342_v21 = vpop.f32.mrf.mxu0  ;;  %v1573_v48 = vadd.f32 %v4308_v17, %v5031_v37  ;;  %4514 = vmatprep.mubr.msk.bf16.mxu1 %vm617_vm3, %v5079_v46  ;;  %v3099_v46 = vpack.c.bf16 %v3071_v35, %v3070_v27  ;;  %v3074_v17 = vld [vmem:[#allocation2 + $0xdc] sm:$0xff] }
 0x1e2   : > { %v1444_v22 = vpop.f32.mrf.mxu1 }
 0x1e3   : > { %v1736_v60 = vpop.f32.mrf.mxu0  ;;  %v5358_v54 = vadd.f32 %v4342_v21, %v1573_v48  ;;  %v1571_v59 = vadd.f32 %v1444_v22, %v5040_v19  ;;  %v3075_v21 = vld [vmem:[#allocation2 + $0xe4] sm:$0xff] }
 0x1e4   : > { %v4309_v3 = vpop.f32.mrf.mxu1 }
 0x1e5   : > { %v4343_v36 = vpop.f32.mrf.mxu0  ;;  %v5361_v61 = vadd.f32 %v1736_v60, %v1571_v59  ;;  %v1574_v8 = vadd.f32 %v4309_v3, %v5057_v25  ;;  %v3076_v60 = vld [vmem:[#allocation2 + $0xf4] sm:$0xff]  ;;  %v3077_v59 = vld [vmem:[#allocation2 + $0xfc] sm:$0xff] }
 0x1e6   : > { %v5364_v37 = vpop.f32.mrf.mxu1 }
 0x1e7   : > { %v5366_v63 = vpop.f32.mrf.mxu0  ;;  %v5368_v52 = vadd.f32 %v4343_v36, %v1574_v8  ;;  %v3101_v36 = vpack.c.bf16 %v3075_v21, %v3074_v17  ;;  %v3404_v8 = vld [vmem:[%s5975_s3] sm:$0x3] }
 0x1e8   : > { %v4312_v40 = vpop.f32.mrf.mxu1  ;;  %4515 = vmatmul.mubr.msk.bf16.gmra.mxu1 %vm617_vm3, %v3099_v46  ;;  %4589 = vmatprep.subr.msk.bf16.mxu0 %vm822_vm1, %v3404_v8 }
 0x1e9   : > { %v4346_v19 = vpop.f32.mrf.mxu0  ;;  %v1577_v39 = vadd.f32 %v4312_v40, %v5225_v49  ;;  %4518 = vmatprep.mubr.msk.bf16.mxu1 %vm617_vm3, %v3100_v45  ;;  %v3461_v40 = vsel %vm822_vm1, %v3404_v8, 0 }
 0x1ea   : > { %v1460_v32 = vpop.f32.mrf.mxu1  ;;  %4543 = vmatpush3.bf16.msra.mxu0 %v3461_v40 }
 0x1eb   : > { %v1752_v23 = vpop.f32.mrf.mxu0  ;;  %v5373_v15 = vadd.f32 %v4346_v19, %v1577_v39  ;;  %v1575_v25 = vadd.f32 %v1460_v32, %v5228_v53  ;;  %v3102_v53 = vpack.c.bf16 %v3077_v59, %v3076_v60 }
 0x1ec   : > { %v4313_v48 = vpop.f32.mrf.mxu1 }
 0x1ed   : > { %v4347_v22 = vpop.f32.mrf.mxu0  ;;  %v5376_v27 = vadd.f32 %v1752_v23, %v1575_v25  ;;  %v1578_v35 = vadd.f32 %v4313_v48, %v5231_v28  ;;  %v3078_v23 = vld [vmem:[#allocation2 + $0x10c] sm:$0xff]  ;;  %v3079_v25 = vld [vmem:[#allocation2 + $0x114] sm:$0xff]  ;;  %v3080_v48 = vld [vmem:[#allocation2 + $0x124] sm:$0xff] }
 0x1ee   : > { %v1463_v3 = vpop.f32.mrf.mxu1 }
 0x1ef   : > { %v5379_v49 = vpop.f32.mrf.mxu0  ;;  %v5381_v55 = vadd.f32 %v4347_v22, %v1578_v35  ;;  %v5384_v7 = vadd.f32 %v1463_v3, %v5238_v41  ;;  %v3081_v22 = vld [vmem:[#allocation2 + $0x12c] sm:$0xff]  ;;  %v3103_v3 = vpack.c.bf16 %v3079_v25, %v3078_v23  ;;  %v3084_v25 = vld [vmem:[#allocation2 + $0x154] sm:$0xff] }
 0x1f0   : > { %v4316_v46 = vpop.f32.mrf.mxu1  ;;  %4519 = vmatmul.mubr.msk.bf16.gmra.mxu1 %vm617_vm3, %v3101_v36 }
 0x1f1   : > { %v4350_v45 = vpop.f32.mrf.mxu0  ;;  %v1581_v28 = vadd.f32 %v4316_v46, %v5245_v51  ;;  %4522 = vmatprep.mubr.msk.bf16.mxu1 %vm617_vm3, %v3102_v53 }
 0x1f2   : > { %v1476_v19 = vpop.f32.mrf.mxu1 }
 0x1f3   : > { %v1768_v41 = vpop.f32.mrf.mxu0  ;;  %v5394_v39 = vadd.f32 %v4350_v45, %v1581_v28  ;;  %v1579_v32 = vadd.f32 %v1476_v19, %v5248_v62  ;;  %v3104_v62 = vpack.c.bf16 %v3081_v22, %v3080_v48 }
 0x1f4   : > { %v4317_v17 = vpop.f32.mrf.mxu1 }
 0x1f5   : > { %v4351_v21 = vpop.f32.mrf.mxu0  ;;  %v5397_v60 = vadd.f32 %v1768_v41, %v1579_v32  ;;  %v1582_v51 = vadd.f32 %v4317_v17, %v5251_v38  ;;  %v3082_v41 = vld [vmem:[#allocation2 + $0x13c] sm:$0xff]  ;;  %v3083_v32 = vld [vmem:[#allocation2 + $0x144] sm:$0xff] }
 0x1f6   : > { %v1479_v59 = vpop.f32.mrf.mxu1  ;;  %v3085_v17 = vld [vmem:[#allocation2 + $0x15c] sm:$0xff] }
 0x1f7   : > { %v5400_v35 = vpop.f32.mrf.mxu0  ;;  %v5402_v36 = vadd.f32 %v4351_v21, %v1582_v51  ;;  %v5405_v53 = vadd.f32 %v1479_v59, %v5258_v14  ;;  %v3105_v51 = vpack.c.bf16 %v3083_v32, %v3082_v41  ;;  %v3087_v41 = vld [vmem:[#allocation2 + $0x174] sm:$0xff] }
 0x1f8   : > { %v4320_v8 = vpop.f32.mrf.mxu1  ;;  %4523 = vmatmul.mubr.msk.bf16.gmra.mxu1 %vm617_vm3, %v3103_v3 }
 0x1f9   : > { %v4354_v46 = vpop.f32.mrf.mxu0  ;;  %v1585_v45 = vadd.f32 %v4320_v8, %v5265_v58  ;;  %4526 = vmatprep.mubr.msk.bf16.mxu1 %vm617_vm3, %v3104_v62 }
 0x1fa   : > { %v1492_v28 = vpop.f32.mrf.mxu1 }
 0x1fb   : > { %v1784_v38 = vpop.f32.mrf.mxu0  ;;  %v5410_v40 = vadd.f32 %v4354_v46, %v1585_v45  ;;  %v1583_v19 = vadd.f32 %v1492_v28, %v5268_v13  ;;  %v3106_v13 = vpack.c.bf16 %v3085_v17, %v3084_v25  ;;  %v1004_v46 = vadd.f32 %v5027_v57, %v5291_v2 }
 0x1fc   : > { %v4321_v23 = vpop.f32.mrf.mxu1 }
 0x1fd   : > { %v4355_v14 = vpop.f32.mrf.mxu0  ;;  %v5413_v21 = vadd.f32 %v1784_v38, %v1583_v19  ;;  %v1586_v48 = vadd.f32 %v4321_v23, %v5271_v18 }
 0x1fe   : > { %v1495_v22 = vpop.f32.mrf.mxu1 }
 0x1ff   : > { %v5416_v58 = vpop.f32.mrf.mxu0  ;;  %v5418_v59 = vadd.f32 %v4355_v14, %v1586_v48  ;;  %v5421_v3 = vadd.f32 %v1495_v22, %v5278_v16  ;;  %v3086_v16 = vld [vmem:[#allocation2 + $0x16c] sm:$0xff]  ;;  %v1296_v14 = vadd.f32 %v5293_v42, %v1004_v46 }
 0x200   : > { %v4324_v62 = vpop.f32.mrf.mxu1  ;;  %4527 = vmatmul.mubr.msk.bf16.gmra.mxu1 %vm617_vm3, %v3105_v51  ;;  %v3107_v48 = vpack.c.bf16 %v3087_v41, %v3086_v16 }
 0x201   : > { %v4358_v8 = vpop.f32.mrf.mxu0  ;;  %v1589_v45 = vadd.f32 %v4324_v62, %v5285_v26  ;;  %4530 = vmatprep.mubr.msk.bf16.mxu1 %vm617_vm3, %v3106_v13 }
 0x202   : > { %v1508_v18 = vpop.f32.mrf.mxu1 }
 0x203   : > { %v1800_v28 = vpop.f32.mrf.mxu0  ;;  %v5428_v38 = vadd.f32 %v4358_v8, %v1589_v45  ;;  %v1587_v19 = vadd.f32 %v1508_v18, %v5288_v31  ;;  %v1008_v31 = vadd.f32 %v5027_v57, %v5312_v56  ;;  %v3092_v45 = vld [vmem:[#allocation2 + $0x1b4] sm:$0xff]  ;;  %v3093_v18 = vld [vmem:[#allocation2 + $0x1bc] sm:$0xff] }
 0x204   : > { %v4325_v32 = vpop.f32.mrf.mxu1 }
 0x205   : > { %v4359_v23 = vpop.f32.mrf.mxu0  ;;  %v5432_v25 = vadd.f32 %v1800_v28, %v1587_v19  ;;  %v1590_v2 = vadd.f32 %v4325_v32, %v5295_v33  ;;  %v1300_v32 = vadd.f32 %v5314_v20, %v1008_v31 }
 0x206   : > { %v1511_v17 = vpop.f32.mrf.mxu1 }
 0x207   : > { %v1803_v26 = vpop.f32.mrf.mxu0  ;;  %v5435_v22 = vadd.f32 %v4359_v23, %v1590_v2  ;;  %v1588_v51 = vadd.f32 %v1511_v17, %v1296_v14 }
 0x208   : > { %v4328_v13 = vpop.f32.mrf.mxu1  ;;  %4531 = vmatmul.mubr.msk.bf16.gmra.mxu1 %vm617_vm3, %v3107_v48 }
 0x209   : > { %v4362_v62 = vpop.f32.mrf.mxu0  ;;  %v5440_v8 = vadd.f32 %v1803_v26, %v1588_v51  ;;  %v1593_v42 = vadd.f32 %v4328_v13, %v5306_v5  ;;  %4534 = vmatprep.mubr.msk.bf16.mxu1 %vm617_vm3, %v5182_v29  ;;  %v3110_v5 = vpack.c.bf16 %v3093_v18, %v3092_v45  ;;  %v3095_v13 = vld [vmem:[#allocation2 + $0x1d4] sm:$0xff] }
 0x20a   : > { %v1524_v33 = vpop.f32.mrf.mxu1 }
 0x20b   : > { %v1816_v46 = vpop.f32.mrf.mxu0  ;;  %v5445_v28 = vadd.f32 %v4362_v62, %v1593_v42  ;;  %v1591_v19 = vadd.f32 %v1524_v33, %v5309_v6  ;;  %v1012_v6 = vadd.f32 %v5027_v57, %v5331_v47 }
 0x20c   : > { %v4329_v16 = vpop.f32.mrf.mxu1 }
 0x20d   : > { %v4363_v41 = vpop.f32.mrf.mxu0  ;;  %v5449_v56 = vadd.f32 %v1816_v46, %v1591_v19  ;;  %v1594_v23 = vadd.f32 %v4329_v16, %v5316_v0  ;;  %v3094_v0 = vld [vmem:[#allocation2 + $0x1cc] sm:$0xff]  ;;  %v1304_v18 = vadd.f32 %v5333_v34, %v1012_v6 }
 0x20e   : > { %v1527_v14 = vpop.f32.mrf.mxu1 }
 0x20f   : > { %v1819_v2 = vpop.f32.mrf.mxu0  ;;  %v5452_v29 = vadd.f32 %v4363_v41, %v1594_v23  ;;  %v1592_v17 = vadd.f32 %v1527_v14, %v1300_v32 }
 0x210   : > { %v4332_v26 = vpop.f32.mrf.mxu1  ;;  %4535 = vmatmul.mubr.msk.bf16.gmra.mxu1 %vm617_vm3, %v5193_v9  ;;  %v3111_v9 = vpack.c.bf16 %v3095_v13, %v3094_v0 }
 0x211   : > { %v4366_v48 = vpop.f32.mrf.mxu0  ;;  %v5458_v51 = vadd.f32 %v1819_v2, %v1592_v17  ;;  %v1597_v20 = vadd.f32 %v4332_v26, %v5325_v44  ;;  %4538 = vmatprep.mubr.msk.bf16.mxu1 %vm617_vm3, %v3110_v5 }
 0x212   : > { %v1540_v62 = vpop.f32.mrf.mxu1 }
 0x213   : > { %v1832_v31 = vpop.f32.mrf.mxu0  ;;  %v5462_v42 = vadd.f32 %v4366_v48, %v1597_v20  ;;  %v1595_v33 = vadd.f32 %v1540_v62, %v5328_v1  ;;  %v1016_v1 = vadd.f32 %v5027_v57, %v5348_v10 }
 0x214   : > { %v4333_v46 = vpop.f32.mrf.mxu1 }
 0x215   : > { %v4367_v45 = vpop.f32.mrf.mxu0  ;;  %v5466_v47 = vadd.f32 %v1832_v31, %v1595_v33  ;;  %v1598_v19 = vadd.f32 %v4333_v46, %v5335_v50  ;;  %v988_v50 = vadd.f32 %v5027_v57, %v5212_v11  ;;  %v1308_v0 = vadd.f32 %v5350_v24, %v1016_v1 }
 0x216   : > { %v1543_v44 = vpop.f32.mrf.mxu1 }
 0x217   : > { %v1835_v16 = vpop.f32.mrf.mxu0  ;;  %v5469_v41 = vadd.f32 %v4367_v45, %v1598_v19  ;;  %v1596_v32 = vadd.f32 %v1543_v44, %v1304_v18 }
 0x218   : > { %v4336_v23 = vpop.f32.mrf.mxu1  ;;  %4539 = vmatmul.mubr.msk.bf16.gmra.mxu1 %vm617_vm3, %v3111_v9 }
 0x219   : > { %v4370_v5 = vpop.f32.mrf.mxu0  ;;  %v5474_v14 = vadd.f32 %v1835_v16, %v1596_v32  ;;  %v1601_v34 = vadd.f32 %v4336_v23, %v5342_v4  ;;  %v1280_v4 = vadd.f32 %v5214_v12, %v988_v50 }
 0x21a   : > { %v1556_v2 = vpop.f32.mrf.mxu1 }
 0x21b   : > { %v1848_v17 = vpop.f32.mrf.mxu0  ;;  %v5479_v26 = vadd.f32 %v4370_v5, %v1601_v34  ;;  %v1599_v48 = vadd.f32 %v1556_v2, %v5345_v43  ;;  %v1572_v45 = vadd.f32 %v5364_v37, %v1280_v4 }
 0x21c   : > { %v4337_v6 = vpop.f32.mrf.mxu1 }
 0x21d   : > { %v4371_v20 = vpop.f32.mrf.mxu0  ;;  %v5483_v13 = vadd.f32 %v1848_v17, %v1599_v48  ;;  %v1602_v10 = vadd.f32 %v4337_v6, %v5352_v30  ;;  %v1864_v12 = vadd.f32 %v5366_v63, %v1572_v45 }
 0x21e   : > { %v1559_v62 = vpop.f32.mrf.mxu1 }
 0x21f   : > { %v1851_v31 = vpop.f32.mrf.mxu0  ;;  %v5487_v33 = vadd.f32 %v4371_v20, %v1602_v10  ;;  %v1600_v46 = vadd.f32 %v1559_v62, %v1308_v0 }
 0x220   : > { %v4376_v57 = vpop.f32.mrf.mxu1 }
 0x221   : > { %v4410_v11 = vpop.f32.mrf.mxu0  ;;  %v5490_v43 = vadd.f32 %v1851_v31, %v1600_v46  ;;  %v2157_v9 = vadd.f32 %v4376_v57, %v5358_v54 }
 0x222   : > { %v2028_v24 = vpop.f32.mrf.mxu1 }
 0x223   : > { %v2320_v18 = vpop.f32.mrf.mxu0  ;;  %v5493_v19 = vadd.f32 %v4410_v11, %v2157_v9  ;;  %v2155_v30 = vadd.f32 %v2028_v24, %v5361_v61 }
 0x224   : > { %v4377_v44 = vpop.f32.mrf.mxu1 }
 0x225   : > { %v5496_v16 = vpop.f32.mrf.mxu0  ;;  %v5499_v32 = vadd.f32 %v2320_v18, %v2155_v30  ;;  %v5502_v23 = vadd.f32 %v4377_v44, %v5368_v52  ;;  %v1868_v52 = vadd.f32 %v5379_v49, %v5384_v7 }
 0x226   : > { %v2031_v37 = vpop.f32.mrf.mxu1 }
 0x227   : > { %v5504_v5 = vpop.f32.mrf.mxu0  ;;  %v5506_v54 = vadd.f32 %v2031_v37, %v1864_v12 }
 0x228   : > { %v4380_v1 = vpop.f32.mrf.mxu1 }
 0x229   : > { %v4414_v34 = vpop.f32.mrf.mxu0  ;;  %v2161_v2 = vadd.f32 %v4380_v1, %v5373_v15 }
 0x22a   : > { %v2044_v61 = vpop.f32.mrf.mxu1 }
 0x22b   : > { %v2336_v17 = vpop.f32.mrf.mxu0  ;;  %v5509_v50 = vadd.f32 %v4414_v34, %v2161_v2  ;;  %v2159_v63 = vadd.f32 %v2044_v61, %v5376_v27 }
 0x22c   : > { %v4381_v48 = vpop.f32.mrf.mxu1 }
 0x22d   : > { %v5512_v6 = vpop.f32.mrf.mxu0  ;;  %v5516_v20 = vadd.f32 %v2336_v17, %v2159_v63  ;;  %v5519_v0 = vadd.f32 %v4381_v48, %v5381_v55  ;;  %v1872_v55 = vadd.f32 %v5400_v35, %v5405_v53 }
 0x22e   : > { %v2047_v10 = vpop.f32.mrf.mxu1 }
 0x22f   : > { %v5521_v62 = vpop.f32.mrf.mxu0  ;;  %v5523_v15 = vadd.f32 %v2047_v10, %v1868_v52 }
 0x230   : > { %v4384_v31 = vpop.f32.mrf.mxu1 }
 0x231   : > { %v4418_v4 = vpop.f32.mrf.mxu0  ;;  %v2165_v27 = vadd.f32 %v4384_v31, %v5394_v39 }
 0x232   : > { %v2060_v46 = vpop.f32.mrf.mxu1 }
 0x233   : > { %v2352_v57 = vpop.f32.mrf.mxu0  ;;  %v5526_v11 = vadd.f32 %v4418_v4, %v2165_v27  ;;  %v2163_v49 = vadd.f32 %v2060_v46, %v5397_v60 }
 0x234   : > { %v4385_v7 = vpop.f32.mrf.mxu1 }
 0x235   : > { %v5529_v45 = vpop.f32.mrf.mxu0  ;;  %v5533_v9 = vadd.f32 %v2352_v57, %v2163_v49  ;;  %v5536_v24 = vadd.f32 %v4385_v7, %v5402_v36  ;;  %v1876_v36 = vadd.f32 %v5416_v58, %v5421_v3 }
 0x236   : > { %v2063_v18 = vpop.f32.mrf.mxu1 }
 0x237   : > { %v5538_v30 = vpop.f32.mrf.mxu0  ;;  %v5540_v39 = vadd.f32 %v2063_v18, %v1872_v55 }
 0x238   : > { %v4388_v44 = vpop.f32.mrf.mxu1 }
 0x239   : > { %v4422_v12 = vpop.f32.mrf.mxu0  ;;  %v2169_v60 = vadd.f32 %v4388_v44, %v5410_v40 }
 0x23a   : > { %v2076_v37 = vpop.f32.mrf.mxu1 }
 0x23b   : > { %v2368_v1 = vpop.f32.mrf.mxu0  ;;  %v5543_v34 = vadd.f32 %v4422_v12, %v2169_v60  ;;  %v2167_v35 = vadd.f32 %v2076_v37, %v5413_v21 }
 0x23c   : > { %v4389_v53 = vpop.f32.mrf.mxu1 }
 0x23d   : > { %v5546_v2 = vpop.f32.mrf.mxu0  ;;  %v5550_v61 = vadd.f32 %v2368_v1, %v2167_v35  ;;  %v5553_v17 = vadd.f32 %v4389_v53, %v5418_v59 }
 0x23e   : > { %v2079_v63 = vpop.f32.mrf.mxu1 }
 0x23f   : > { %v5555_v48 = vpop.f32.mrf.mxu0  ;;  %v5557_v40 = vadd.f32 %v2079_v63, %v1876_v36 }
 0x240   : > { %v4392_v52 = vpop.f32.mrf.mxu1 }
 0x241   : > { %v4426_v10 = vpop.f32.mrf.mxu0  ;;  %v2173_v21 = vadd.f32 %v4392_v52, %v5428_v38 }
 0x242   : > { %v2092_v31 = vpop.f32.mrf.mxu1 }
 0x243   : > { %v2384_v4 = vpop.f32.mrf.mxu0  ;;  %v5560_v27 = vadd.f32 %v4426_v10, %v2173_v21  ;;  %v2171_v58 = vadd.f32 %v2092_v31, %v5432_v25 }
 0x244   : > { %v4393_v3 = vpop.f32.mrf.mxu1 }
 0x245   : > { %v5563_v46 = vpop.f32.mrf.mxu0  ;;  %v5565_v59 = vadd.f32 %v2384_v4, %v2171_v58  ;;  %v5568_v57 = vadd.f32 %v4393_v3, %v5435_v22 }
 0x246   : > { %v2095_v49 = vpop.f32.mrf.mxu1 }
 0x247   : > { %v5570_v7 = vpop.f32.mrf.mxu0  ;;  %v5573_v55 = vadd.f32 %v2095_v49, %v5440_v8 }
 0x248   : > { %v4396_v38 = vpop.f32.mrf.mxu1 }
 0x249   : > { %v4430_v18 = vpop.f32.mrf.mxu0  ;;  %v2177_v44 = vadd.f32 %v4396_v38, %v5445_v28 }
 0x24a   : > { %v2108_v12 = vpop.f32.mrf.mxu1 }
 0x24b   : > { %v2400_v25 = vpop.f32.mrf.mxu0  ;;  %v5576_v60 = vadd.f32 %v4430_v18, %v2177_v44  ;;  %v2175_v37 = vadd.f32 %v2108_v12, %v5449_v56 }
 0x24c   : > { %v4397_v1 = vpop.f32.mrf.mxu1 }
 0x24d   : > { %v5579_v35 = vpop.f32.mrf.mxu0  ;;  %v5581_v22 = vadd.f32 %v2400_v25, %v2175_v37  ;;  %v5584_v53 = vadd.f32 %v4397_v1, %v5452_v29 }
 0x24e   : > { %5979 = vst [vmem:[#allocation3_spill] sm:$0xff] %v5579_v35  ;;  %v2111_v8 = vpop.f32.mrf.mxu1 }
 0x24f   : > { %5980 = vst [vmem:[#allocation4_spill] sm:$0xff] %v5584_v53  ;;  %v5586_v36 = vpop.f32.mrf.mxu0  ;;  %v5589_v63 = vadd.f32 %v2111_v8, %v5458_v51 }
 0x250   : > { %5981 = vst [vmem:[#allocation5_spill] sm:$0xff] %v5586_v36  ;;  %v4400_v28 = vpop.f32.mrf.mxu1 }
 0x251   : > { %5982 = vst [vmem:[#allocation6_spill] sm:$0xff] %v5589_v63  ;;  %v4434_v52 = vpop.f32.mrf.mxu0  ;;  %v2181_v10 = vadd.f32 %v4400_v28, %v5462_v42 }
 0x252   : > { %v2124_v21 = vpop.f32.mrf.mxu1 }
 0x253   : > { %v2416_v56 = vpop.f32.mrf.mxu0  ;;  %v5592_v31 = vadd.f32 %v4434_v52, %v2181_v10  ;;  %v2179_v4 = vadd.f32 %v2124_v21, %v5466_v47 }
 0x254   : > { %v4401_v58 = vpop.f32.mrf.mxu1 }
 0x255   : > { %v5595_v3 = vpop.f32.mrf.mxu0  ;;  %v5597_v29 = vadd.f32 %v2416_v56, %v2179_v4  ;;  %v5600_v49 = vadd.f32 %v4401_v58, %v5469_v41 }
 0x256   : > { %5983 = vst [vmem:[#allocation7_spill] sm:$0xff] %v5595_v3  ;;  %v2127_v51 = vpop.f32.mrf.mxu1 }
 0x257   : > { %5984 = vst [vmem:[#allocation8_spill] sm:$0xff] %v5600_v49  ;;  %v5602_v38 = vpop.f32.mrf.mxu0  ;;  %v5605_v18 = vadd.f32 %v2127_v51, %v5474_v14 }
 0x258   : > { %5985 = vst [vmem:[#allocation9_spill] sm:$0xff] %v5602_v38  ;;  %v4404_v42 = vpop.f32.mrf.mxu1 }
 0x259   : > { %5986 = vst [vmem:[#allocation10_spill] sm:$0xff] %v5605_v18  ;;  %v4438_v44 = vpop.f32.mrf.mxu0  ;;  %v2185_v12 = vadd.f32 %v4404_v42, %v5479_v26 }
 0x25a   : > { %v2140_v25 = vpop.f32.mrf.mxu1 }
 0x25b   : > { %v2432_v47 = vpop.f32.mrf.mxu0  ;;  %v5608_v37 = vadd.f32 %v4438_v44, %v2185_v12  ;;  %v2183_v1 = vadd.f32 %v2140_v25, %v5483_v13 }
 0x25c   : > { %v4405_v8 = vpop.f32.mrf.mxu1 }
 0x25d   : > { %v5611_v28 = vpop.f32.mrf.mxu0  ;;  %v5613_v41 = vadd.f32 %v2432_v47, %v2183_v1  ;;  %v5616_v52 = vadd.f32 %v4405_v8, %v5487_v33 }
 0x25e   : > { %5987 = vst [vmem:[#allocation11_spill] sm:$0xff] %v5611_v28  ;;  %v2143_v14 = vpop.f32.mrf.mxu1 }
 0x25f   : > { %5988 = vst [vmem:[#allocation12_spill] sm:$0xff] %v5616_v52  ;;  %v5618_v10 = vpop.f32.mrf.mxu0  ;;  %v5621_v21 = vadd.f32 %v2143_v14, %v5490_v43 }
 0x260   : > { %5989 = vst [vmem:[#allocation13_spill] sm:$0xff] %v5618_v10  ;;  %v4444_v26 = vpop.f32.mrf.mxu1 }
 0x261   : > { %5990 = vst [vmem:[#allocation14_spill] sm:$0xff] %v5621_v21  ;;  %v5623_v56 = vpop.f32.mrf.mxu0  ;;  %v5626_v4 = vadd.f32 %v4444_v26, %v5493_v19 }
 0x262   : > { %v2613_v13 = vpop.f32.mrf.mxu1 }
 0x263   : > { %v5629_v58 = vadd.f32 %v2613_v13, %v5499_v32  ;;  %v5631_v51 = vpop.f32.mrf.mxu0 }
 0x264   : > { %v4445_v33 = vpop.f32.mrf.mxu1 }
 0x265   : > { %v5635_v44 = vpop.f32.mrf.mxu0 }
 0x266   : > { %v5633_v42 = vpop.f32.mrf.mxu1 }
 0x267   : > { %v5643_v19 = vpop.f32.mrf.mxu0 }
 0x268   : > { %v4448_v12 = vpop.f32.mrf.mxu1 }
 0x269   : > { %v5638_v43 = vadd.f32 %v4448_v12, %v5509_v50  ;;  %v5649_v8 = vpop.f32.mrf.mxu0 }
 0x26a   : > { %v2629_v25 = vpop.f32.mrf.mxu1 }
 0x26b   : > { %v5641_v47 = vadd.f32 %v2629_v25, %v5516_v20  ;;  %v5657_v12 = vpop.f32.mrf.mxu0 }
 0x26c   : > { %v5645_v1 = vpop.f32.mrf.mxu1 }
 0x26d   : > { %v5663_v10 = vpop.f32.mrf.mxu0 }
 0x26e   : > { %v5647_v32 = vpop.f32.mrf.mxu1 }
 0x270   : > { %v4452_v14 = vpop.f32.mrf.mxu1 }
 0x271   : > { %v5652_v26 = vadd.f32 %v4452_v14, %v5526_v11  ;;  %v5671_v14 = vpop.f32.mrf.mxu0 }
 0x272   : > { %v2645_v13 = vpop.f32.mrf.mxu1 }
 0x273   : > { %v5655_v50 = vadd.f32 %v2645_v13, %v5533_v9  ;;  %v5677_v38 = vpop.f32.mrf.mxu0 }
 0x274   : > { %v5659_v20 = vpop.f32.mrf.mxu1 }
 0x276   : > { %v5661_v25 = vpop.f32.mrf.mxu1 }
 0x278   : > { %v4456_v21 = vpop.f32.mrf.mxu1 }
 0x279   : > { %v5666_v28 = vadd.f32 %v4456_v21, %v5543_v34  ;;  %v5685_v21 = vpop.f32.mrf.mxu0 }
 0x27a   : > { %v2661_v52 = vpop.f32.mrf.mxu1 }
 0x27b   : > { %v5669_v11 = vadd.f32 %v2661_v52, %v5550_v61  ;;  %v5691_v36 = vpop.f32.mrf.mxu0 }
 0x27c   : > { %v5673_v9 = vpop.f32.mrf.mxu1 }
 0x27e   : > { %v5675_v13 = vpop.f32.mrf.mxu1 }
 0x280   : > { %v4460_v18 = vpop.f32.mrf.mxu1 }
 0x281   : > { %v5680_v3 = vadd.f32 %v4460_v18, %v5560_v27  ;;  %v5699_v18 = vpop.f32.mrf.mxu0 }
 0x282   : > { %v2677_v49 = vpop.f32.mrf.mxu1 }
 0x283   : > { %5991 = vst [vmem:[#allocation15_spill] sm:$0xff] %v5680_v3  ;;  %v5683_v34 = vadd.f32 %v2677_v49, %v5565_v59 }
 0x284   : > { %v5687_v61 = vpop.f32.mrf.mxu1 }
 0x285   : > { %5992 = vst [vmem:[#allocation16_spill] sm:$0xff] %v5683_v34  ;;  %5993 = vst [vmem:[#allocation17_spill] sm:$0xff] %v5687_v61  ;;  %v5705_v34 = vpop.f32.mrf.mxu0 }
 0x286   : > { %v5689_v52 = vpop.f32.mrf.mxu1 }
 0x287   : > { %5994 = vst [vmem:[#allocation18_spill] sm:$0xff] %v5689_v52 }
 0x288   : > { %v4464_v63 = vpop.f32.mrf.mxu1 }
 0x289   : > { %v5694_v35 = vadd.f32 %v4464_v63, %v5576_v60  ;;  %v5713_v63 = vpop.f32.mrf.mxu0 }
 0x28a   : > { %v2693_v53 = vpop.f32.mrf.mxu1 }
 0x28b   : > { %5995 = vst [vmem:[#allocation19_spill] sm:$0xff] %v5694_v35  ;;  %v5697_v27 = vadd.f32 %v2693_v53, %v5581_v22 }
 0x28c   : > { %v5701_v59 = vpop.f32.mrf.mxu1 }
 0x28d   : > { %5996 = vst [vmem:[#allocation20_spill] sm:$0xff] %v5697_v27  ;;  %5997 = vst [vmem:[#allocation21_spill] sm:$0xff] %v5701_v59  ;;  %v5719_v27 = vpop.f32.mrf.mxu0 }
 0x28e   : > { %v5703_v49 = vpop.f32.mrf.mxu1 }
 0x28f   : > { %5998 = vst [vmem:[#allocation22_spill] sm:$0xff] %v5703_v49 }
 0x290   : > { %v4468_v3 = vpop.f32.mrf.mxu1 }
 0x291   : > { %v5708_v52 = vadd.f32 %v4468_v3, %v5592_v31  ;;  %v5727_v3 = vpop.f32.mrf.mxu0 }
 0x292   : > { %v2709_v61 = vpop.f32.mrf.mxu1 }
 0x293   : > { %5999 = vst [vmem:[#allocation23_spill] sm:$0xff] %v5708_v52  ;;  %v5711_v60 = vadd.f32 %v2709_v61, %v5597_v29  ;;  %v2450_v61 = vadd.f32 %v5496_v16, %v5502_v23 }
 0x294   : > { %v5715_v22 = vpop.f32.mrf.mxu1 }
 0x295   : > { %6000 = vst [vmem:[#allocation24_spill] sm:$0xff] %v5711_v60  ;;  %6001 = vst [vmem:[#allocation25_spill] sm:$0xff] %v5715_v22  ;;  %v2743_v52 = vadd.f32 %v4445_v33, %v2450_v61  ;;  %v5737_v22 = vpop.f32.mrf.mxu0 }
 0x296   : > { %v5717_v53 = vpop.f32.mrf.mxu1 }
 0x297   : > { %6002 = vst [vmem:[#allocation26_spill] sm:$0xff] %v5717_v53  ;;  %v2448_v53 = vadd.f32 %v5504_v5, %v5506_v54  ;;  %v3035_v16 = vadd.f32 %v5635_v44, %v2743_v52  ;;  %v2454_v5 = vadd.f32 %v5512_v6, %v5519_v0  ;;  %v3038_v52 = vadd.f32 %v5649_v8, %v5638_v43 }
 0x298   : > { %v4472_v35 = vpop.f32.mrf.mxu1  ;;  %v2458_v43 = vadd.f32 %v5529_v45, %v5536_v24  ;;  %v3042_v45 = vadd.f32 %v5677_v38, %v5652_v26  ;;  %v2462_v38 = vadd.f32 %v5546_v2, %v5553_v17  ;;  %v3046_v2 = vadd.f32 %v5705_v34, %v5666_v28 }
 0x299   : > { %v5722_v49 = vadd.f32 %v4472_v35, %v5608_v37  ;;  %v3034_v37 = vadd.f32 %v5623_v56, %v5626_v4  ;;  %v2452_v56 = vadd.f32 %v5521_v62, %v5523_v15  ;;  %v3036_v62 = vadd.f32 %v5657_v12, %v5641_v47 }
 0x29a   : > { %v2725_v59 = vpop.f32.mrf.mxu1  ;;  %v2466_v28 = vadd.f32 %v5563_v46, %v5568_v57 }
 0x29b   : > { %6003 = vst [vmem:[#allocation27_spill] sm:$0xff] %v5722_v49  ;;  %v5725_v31 = vadd.f32 %v2725_v59, %v5613_v41  ;;  %v2741_v41 = vadd.f32 %v5633_v42, %v2448_v53  ;;  %v2747_v42 = vadd.f32 %v5645_v1, %v2454_v5  ;;  %v2745_v6 = vadd.f32 %v5647_v32, %v2452_v56 }
 0x29c   : > { %v5729_v29 = vpop.f32.mrf.mxu1 }
 0x29d   : > { %6004 = vst [vmem:[#allocation28_spill] sm:$0xff] %v5725_v31  ;;  %v3032_v31 = vadd.f32 %v5631_v51, %v5629_v58  ;;  %v3033_v54 = vadd.f32 %v5643_v19, %v2741_v41  ;;  %v3039_v15 = vadd.f32 %v5663_v10, %v2747_v42  ;;  %v3037_v8 = vadd.f32 %v5671_v14, %v2745_v6 }
 0x29e   : > { %v5733_v60 = vpop.f32.mrf.mxu1  ;;  %v2751_v10 = vadd.f32 %v5659_v20, %v2458_v43 }
 0x29f   : > { %6005 = vst [vmem:[#allocation29_spill] sm:$0xff] %v5733_v60  ;;  %v5745_v60 = vpop.f32.mrf.mxu0 }
 0x2a0   : > { %v4512_v35 = vpop.f32.mrf.mxu1  ;;  %v3043_v20 = vadd.f32 %v5691_v36, %v2751_v10  ;;  %v2755_v36 = vadd.f32 %v5673_v9, %v2462_v38  ;;  %v6008_v10 = vld [vmem:[#allocation18_spill] sm:$0xff] }
 0x2a1   : > { %v3326_v23 = vadd.f32 %v4512_v35, %v3034_v37  ;;  %v5755_v53 = vpop.f32.mrf.mxu0  ;;  %v6012_v38 = vld [vmem:[#allocation6_spill] sm:$0xff] }
 0x2a2   : > { %v3197_v59 = vpop.f32.mrf.mxu1 }
 0x2a3   : > { %v3324_v33 = vadd.f32 %v3197_v59, %v3032_v31  ;;  %v3358_v58 = vmax.f32 %v3326_v23, 0.0  ;;  %v5761_v41 = vpop.f32.mrf.mxu0  ;;  %v2456_v23 = vadd.f32 %v5538_v30, %v5540_v39  ;;  %v3040_v39 = vadd.f32 %v5685_v21, %v5655_v50 }
 0x2a4   : > { %v4513_v49 = vpop.f32.mrf.mxu1 }
 0x2a5   : > { %v3327_v61 = vadd.f32 %v4513_v49, %v3035_v16  ;;  %v3356_v0 = vmax.f32 %v3324_v33, 0.0  ;;  %v5773_v24 = vpop.f32.mrf.mxu0  ;;  %v2749_v33 = vadd.f32 %v5661_v25, %v2456_v23 }
 0x2a6   : > { %v3200_v4 = vpop.f32.mrf.mxu1 }
 0x2a7   : > { %v3359_v51 = vmax.f32 %v3327_v61, 0.0  ;;  %v3325_v44 = vadd.f32 %v3200_v4, %v3033_v54  ;;  %v3041_v26 = vadd.f32 %v5699_v18, %v2749_v33 }
 0x2a8   : > { %v4516_v35 = vpop.f32.mrf.mxu1 }
 0x2a9   : > { %v3389_v19 = vpack.c.bf16 %v3359_v51, %v3358_v58  ;;  %v3357_v49 = vmax.f32 %v3325_v44, 0.0  ;;  %v3330_v37 = vadd.f32 %v4516_v35, %v3038_v52  ;;  %v5779_v51 = vpop.f32.mrf.mxu0  ;;  %v2460_v35 = vadd.f32 %v5555_v48, %v5557_v40 }
 0x2aa   : > { %v3213_v31 = vpop.f32.mrf.mxu1  ;;  %v3044_v48 = vadd.f32 %v5713_v63, %v5669_v11  ;;  %v3047_v40 = vadd.f32 %v5719_v27, %v2755_v36  ;;  %v6006_v11 = vld [vmem:[#allocation17_spill] sm:$0xff] }
 0x2ab   : > { %v3388_v1 = vpack.c.bf16 %v3357_v49, %v3356_v0  ;;  %v3328_v32 = vadd.f32 %v3213_v31, %v3036_v62  ;;  %v3362_v12 = vmax.f32 %v3330_v37, 0.0  ;;  %v4499_v17 = vpop.f32.mrf.mxu0  ;;  %v2759_v27 = vadd.f32 %v6006_v11, %v2466_v28  ;;  %v6020_v11 = vld [vmem:[#allocation10_spill] sm:$0xff] }
 0x2ac   : > { %v4517_v59 = vpop.f32.mrf.mxu1 }
 0x2ad   : > { %v3331_v16 = vadd.f32 %v4517_v59, %v3039_v15  ;;  %4544 = vmatprep.mubr.msk.bf16.mxu0 %vm617_vm3, %v3388_v1  ;;  %v3360_v61 = vmax.f32 %v3328_v32, 0.0  ;;  %v2988_v37 = vpop.f32.mrf.mxu0  ;;  %v3051_v33 = vadd.f32 %v5755_v53, %v2759_v27  ;;  %v6021_v27 = vld [vmem:[#allocation9_spill] sm:$0xff] }
 0x2ae   : > { %v3216_v47 = vpop.f32.mrf.mxu1  ;;  %4545 = vmatmul.mubr.msk.bf16.vlgmr.msra.gmra.mxu0 %vm617_vm3, %v3389_v19  ;;  %v2753_v19 = vadd.f32 %v5675_v13, %v2460_v35 }
 0x2af   : > { %v3363_v5 = vmax.f32 %v3331_v16, 0.0  ;;  %v3329_v54 = vadd.f32 %v3216_v47, %v3037_v8  ;;  %v2464_v8 = vadd.f32 %v5570_v7, %v5573_v55  ;;  %v6007_v47 = vld [vmem:[#allocation15_spill] sm:$0xff]  ;;  %v4502_v57 = vpop.f32.mrf.mxu0  ;;  %v6009_v7 = vld [vmem:[#allocation16_spill] sm:$0xff] }
 0x2b0   : > { %v4520_v14 = vpop.f32.mrf.mxu1  ;;  %v3045_v34 = vadd.f32 %v5727_v3, %v2753_v19  ;;  %v3050_v46 = vadd.f32 %v5737_v22, %v6007_v47  ;;  %v3048_v55 = vadd.f32 %v5745_v60, %v6009_v7  ;;  %v6014_v60 = vld [vmem:[#allocation21_spill] sm:$0xff] }
 0x2b1   : > { %v3391_v56 = vpack.c.bf16 %v3363_v5, %v3362_v12  ;;  %v3361_v4 = vmax.f32 %v3329_v54, 0.0  ;;  %v3334_v58 = vadd.f32 %v4520_v14, %v3042_v45  ;;  %v2757_v12 = vadd.f32 %v6008_v10, %v2464_v8  ;;  %v6023_v10 = vld [vmem:[#allocation23_spill] sm:$0xff] }
 0x2b2   : > { %v3229_v30 = vpop.f32.mrf.mxu1 }
 0x2b3   : > { %v3390_v42 = vpack.c.bf16 %v3361_v4, %v3360_v61  ;;  %v3332_v25 = vadd.f32 %v3229_v30, %v3040_v39  ;;  %v3366_v21 = vmax.f32 %v3334_v58, 0.0  ;;  %v3001_v4 = vpop.f32.mrf.mxu0  ;;  %v6010_v39 = vld [vmem:[#allocation4_spill] sm:$0xff] }
 0x2b4   : > { %v4521_v44 = vpop.f32.mrf.mxu1 }
 0x2b5   : > { %v3335_v52 = vadd.f32 %v4521_v44, %v3043_v20  ;;  %4548 = vmatprep.mubr.msk.bf16.mxu0 %vm617_vm3, %v3390_v42  ;;  %v3364_v49 = vmax.f32 %v3332_v25, 0.0  ;;  %v6011_v20 = vld [vmem:[#allocation3_spill] sm:$0xff]  ;;  %v3049_v42 = vadd.f32 %v5761_v41, %v2757_v12  ;;  %v3058_v12 = vadd.f32 %v4502_v57, %v6023_v10 }
 0x2b6   : > { %v3232_v50 = vpop.f32.mrf.mxu1  ;;  %4549 = vmatmul.mubr.msk.bf16.gmra.mxu0 %vm617_vm3, %v3391_v56  ;;  %v2470_v22 = vadd.f32 %v6011_v20, %v6010_v39 }
 0x2b7   : > { %v3367_v6 = vmax.f32 %v3335_v52, 0.0  ;;  %v3333_v0 = vadd.f32 %v3232_v50, %v3041_v26  ;;  %v6013_v26 = vld [vmem:[#allocation5_spill] sm:$0xff] }
 0x2b8   : > { %v4524_v18 = vpop.f32.mrf.mxu1  ;;  %v2468_v25 = vadd.f32 %v6013_v26, %v6012_v38  ;;  %v2763_v53 = vadd.f32 %v6014_v60, %v2470_v22 }
 0x2b9   : > { %v3393_v31 = vpack.c.bf16 %v3367_v6, %v3366_v21  ;;  %v3365_v62 = vmax.f32 %v3333_v0, 0.0  ;;  %v3338_v1 = vadd.f32 %v4524_v18, %v3046_v2  ;;  %v6015_v21 = vld [vmem:[#allocation19_spill] sm:$0xff]  ;;  %v4503_v0 = vpop.f32.mrf.mxu0  ;;  %v6016_v2 = vld [vmem:[#allocation22_spill] sm:$0xff] }
 0x2ba   : > { %v3245_v15 = vpop.f32.mrf.mxu1  ;;  %v3054_v6 = vadd.f32 %v5773_v24, %v6015_v21  ;;  %v2761_v18 = vadd.f32 %v6016_v2, %v2468_v25  ;;  %v6028_v25 = vld [vmem:[#allocation14_spill] sm:$0xff]  ;;  %v6031_v2 = vld [vmem:[#allocation29_spill] sm:$0xff] }
 0x2bb   : > { %v3392_v9 = vpack.c.bf16 %v3365_v62, %v3364_v49  ;;  %v3336_v43 = vadd.f32 %v3245_v15, %v3044_v48  ;;  %v3370_v63 = vmax.f32 %v3338_v1, 0.0  ;;  %v6017_v15 = vld [vmem:[#allocation20_spill] sm:$0xff] }
 0x2bc   : > { %v4525_v59 = vpop.f32.mrf.mxu1  ;;  %v3052_v48 = vadd.f32 %v5779_v51, %v6017_v15  ;;  %v3053_v24 = vadd.f32 %v2988_v37, %v2761_v18  ;;  %v6022_v51 = vld [vmem:[#allocation25_spill] sm:$0xff]  ;;  %v6024_v37 = vld [vmem:[#allocation26_spill] sm:$0xff] }
 0x2bd   : > { %v3339_v13 = vadd.f32 %v4525_v59, %v3047_v40  ;;  %4552 = vmatprep.mubr.msk.bf16.mxu0 %vm617_vm3, %v3392_v9  ;;  %v3368_v5 = vmax.f32 %v3336_v43, 0.0  ;;  %v3055_v40 = vadd.f32 %v4499_v17, %v2763_v53  ;;  %v3004_v59 = vpop.f32.mrf.mxu0  ;;  %v6019_v43 = vld [vmem:[#allocation7_spill] sm:$0xff] }
 0x2be   : > { %v3248_v32 = vpop.f32.mrf.mxu1  ;;  %4553 = vmatmul.mubr.msk.bf16.gmra.mxu0 %vm617_vm3, %v3393_v31 }
 0x2bf   : > { %v3371_v16 = vmax.f32 %v3339_v13, 0.0  ;;  %v3337_v23 = vadd.f32 %v3248_v32, %v3045_v34  ;;  %v6018_v34 = vld [vmem:[#allocation8_spill] sm:$0xff] }
 0x2c0   : > { %v4528_v3 = vpop.f32.mrf.mxu1  ;;  %v2474_v13 = vadd.f32 %v6019_v43, %v6018_v34 }
 0x2c1   : > { %v3395_v54 = vpack.c.bf16 %v3371_v16, %v3370_v63  ;;  %v3369_v45 = vmax.f32 %v3337_v23, 0.0  ;;  %v3342_v56 = vadd.f32 %v4528_v3, %v3050_v46  ;;  %v2472_v63 = vadd.f32 %v6021_v27, %v6020_v11  ;;  %v4506_v16 = vpop.f32.mrf.mxu0 }
 0x2c2   : > { %v3261_v14 = vpop.f32.mrf.mxu1  ;;  %v2767_v17 = vadd.f32 %v6022_v51, %v2474_v13  ;;  %v4631_v51 = vld [vmem:[%s4712_s30 + $0x8] sm:$0xff]  }
 0x2c3   : > { %v3394_v61 = vpack.c.bf16 %v3369_v45, %v3368_v5  ;;  %v3340_v58 = vadd.f32 %v3261_v14, %v3048_v55  ;;  %v3374_v35 = vmax.f32 %v3342_v56, 0.0  ;;  %v3017_v55 = vpop.f32.mrf.mxu0 }
 0x2c4   : > { %v4529_v30 = vpop.f32.mrf.mxu1 }
 0x2c5   : > { %v3343_v44 = vadd.f32 %v4529_v30, %v3051_v33  ;;  %4556 = vmatprep.mubr.msk.bf16.mxu0 %vm617_vm3, %v3394_v61  ;;  %v3372_v19 = vmax.f32 %v3340_v58, 0.0  ;;  %v6025_v61 = vld [vmem:[#allocation24_spill] sm:$0xff]  ;;  %v3059_v30 = vadd.f32 %v4503_v0, %v2767_v17  ;;  %v6027_v58 = vld [vmem:[#allocation11_spill] sm:$0xff]  ;;  %v4507_v53 = vpop.f32.mrf.mxu0  ;;  %v3626_v17 = vunpack.c.l.bf16 %v4631_v51 }
 0x2c6   : > { %v3264_v52 = vpop.f32.mrf.mxu1  ;;  %4557 = vmatmul.mubr.msk.bf16.gmra.mxu0 %vm617_vm3, %v3395_v54  ;;  %v2765_v54 = vadd.f32 %v6024_v37, %v2472_v63  ;;  %v3056_v56 = vadd.f32 %v3001_v4, %v6025_v61 }
 0x2c7   : > { %v3375_v50 = vmax.f32 %v3343_v44, 0.0  ;;  %v3341_v36 = vadd.f32 %v3264_v52, %v3049_v42  ;;  %v6026_v42 = vld [vmem:[#allocation12_spill] sm:$0xff]  ;;  %v6029_v52 = vld [vmem:[#allocation13_spill] sm:$0xff] }
 0x2c8   : > { %v4532_v41 = vpop.f32.mrf.mxu1  ;;  %v2478_v44 = vadd.f32 %v6027_v58, %v6026_v42  ;;  %v3057_v38 = vadd.f32 %v3004_v59, %v2765_v54  ;;  %v2476_v60 = vadd.f32 %v6029_v52, %v6028_v25  ;;  %v3627_v54 = vunpack.c.h.bf16 %v4631_v51  ;;  %v4637_v51 = vld [vmem:[%s4712_s30 + $0x38] sm:$0xff]  }
 0x2c9   : > { %v3397_v49 = vpack.c.bf16 %v3375_v50, %v3374_v35  ;;  %v3373_v31 = vmax.f32 %v3341_v36, 0.0  ;;  %v3346_v1 = vadd.f32 %v4532_v41, %v3054_v6  ;;  %v6030_v6 = vld [vmem:[#allocation27_spill] sm:$0xff] }
 0x2ca   : > { %v3277_v62 = vpop.f32.mrf.mxu1  ;;  %v2771_v4 = vadd.f32 %v5729_v29, %v2478_v44  ;;  %v3062_v0 = vadd.f32 %v4506_v16, %v6030_v6  ;;  %v2769_v18 = vadd.f32 %v6031_v2, %v2476_v60 }
 0x2cb   : > { %v3396_v9 = vpack.c.bf16 %v3373_v31, %v3372_v19  ;;  %v3344_v8 = vadd.f32 %v3277_v62, %v3052_v48  ;;  %v3378_v47 = vmax.f32 %v3346_v1, 0.0  ;;  %v3020_v62 = vpop.f32.mrf.mxu0  ;;  %v6032_v48 = vld [vmem:[#allocation28_spill] sm:$0xff] }
 0x2cc   : > { %v4533_v28 = vpop.f32.mrf.mxu1  ;;  %v3061_v29 = vadd.f32 %v3020_v62, %v2769_v18 }
 0x2cd   : > { %v3347_v32 = vadd.f32 %v4533_v28, %v3055_v40  ;;  %4560 = vmatprep.mubr.msk.bf16.mxu0 %vm617_vm3, %v3396_v9  ;;  %v3376_v45 = vmax.f32 %v3344_v8, 0.0  ;;  %v3060_v40 = vadd.f32 %v3017_v55, %v6032_v48  ;;  %v3063_v9 = vadd.f32 %v4507_v53, %v2771_v4 }
 0x2ce   : > { %v3280_v23 = vpop.f32.mrf.mxu1  ;;  %4561 = vmatmul.mubr.msk.bf16.gmra.mxu0 %vm617_vm3, %v3397_v49 }
 0x2cf   : > { %v3379_v46 = vmax.f32 %v3347_v32, 0.0  ;;  %v3345_v3 = vadd.f32 %v3280_v23, %v3053_v24  ;;  %v5849_v23 = vld [vmem:[%s5977_s5] ss:$0 sm:$0xff] }
 0x2d0   : > { %v4536_v5 = vpop.f32.mrf.mxu1 }
 0x2d1   : > { %v3399_v14 = vpack.c.bf16 %v3379_v46, %v3378_v47  ;;  %v3377_v7 = vmax.f32 %v3345_v3, 0.0  ;;  %v3350_v20 = vadd.f32 %v4536_v5, %v3058_v12  ;;  %v4632_v46 = vld [vmem:[%s4712_s30] sm:$0xff]  }
 0x2d2   : > { %v3293_v33 = vpop.f32.mrf.mxu1  ;;  %v3624_v3 = vunpack.c.l.bf16 %v4632_v46 }
 0x2d3   : > { %v3398_v39 = vpack.c.bf16 %v3377_v7, %v3376_v45  ;;  %v3348_v26 = vadd.f32 %v3293_v33, %v3056_v56  ;;  %v3382_v50 = vmax.f32 %v3350_v20, 0.0  ;;  %v4633_v20 = vld [vmem:[%s4712_s30 + $0x18] sm:$0xff]  }
 0x2d4   : > { %v4537_v22 = vpop.f32.mrf.mxu1 }
 0x2d5   : > { %v3351_v57 = vadd.f32 %v4537_v22, %v3059_v30  ;;  %4564 = vmatprep.mubr.msk.bf16.mxu0 %vm617_vm3, %v3398_v39  ;;  %v3380_v19 = vmax.f32 %v3348_v26, 0.0  ;;  %v3630_v22 = vunpack.c.l.bf16 %v4633_v20  ;;  %v4634_v26 = vld [vmem:[%s4712_s30 + $0x10] sm:$0xff]  }
 0x2d6   : > { %v3296_v35 = vpop.f32.mrf.mxu1  ;;  %4565 = vmatmul.mubr.msk.bf16.gmra.mxu0 %vm617_vm3, %v3399_v14  ;;  %v3625_v14 = vunpack.c.h.bf16 %v4632_v46  ;;  %v3629_v6 = vunpack.c.h.bf16 %v4634_v26 }
 0x2d7   : > { %v3383_v36 = vmax.f32 %v3351_v57, 0.0  ;;  %v3349_v21 = vadd.f32 %v3296_v35, %v3057_v38  ;;  %v3628_v57 = vunpack.c.l.bf16 %v4634_v26  ;;  %v3631_v35 = vunpack.c.h.bf16 %v4633_v20  ;;  %v4640_v26 = vld [vmem:[%s4712_s30 + $0x40] sm:$0xff]  }
 0x2d8   : > { %v4540_v41 = vpop.f32.mrf.mxu1 }
 0x2d9   : > { %v3401_v49 = vpack.c.bf16 %v3383_v36, %v3382_v50  ;;  %v3381_v31 = vmax.f32 %v3349_v21, 0.0  ;;  %v3354_v59 = vadd.f32 %v4540_v41, %v3062_v0 }
 0x2da   : > { %v3309_v15 = vpop.f32.mrf.mxu1 }
 0x2db   : > { %v3400_v1 = vpack.c.bf16 %v3381_v31, %v3380_v19  ;;  %v3352_v34 = vadd.f32 %v3309_v15, %v3060_v40  ;;  %v3386_v24 = vmax.f32 %v3354_v59, 0.0  ;;  %v4635_v19 = vld [vmem:[%s4712_s30 + $0x28] sm:$0xff]   ;;  %v4636_v40 = vld [vmem:[%s4712_s30 + $0x20] sm:$0xff]  }
 0x2dc   : > { %v4541_v28 = vpop.f32.mrf.mxu1 }
 0x2dd   : > { %v3355_v43 = vadd.f32 %v4541_v28, %v3063_v9  ;;  %4568 = vmatprep.mubr.msk.bf16.mxu0 %vm617_vm3, %v3400_v1  ;;  %v3384_v11 = vmax.f32 %v3352_v34, 0.0  ;;  %v3632_v9 = vunpack.c.l.bf16 %v4636_v40  ;;  %v3635_v34 = vunpack.c.h.bf16 %v4635_v19 }
 0x2de   : > { %v3312_v13 = vpop.f32.mrf.mxu1  ;;  %4569 = vmatmul.mubr.msk.bf16.gmra.mxu0 %vm617_vm3, %v3401_v49  ;;  %v3634_v49 = vunpack.c.l.bf16 %v4635_v19 }
 0x2df   : > { %v3387_v8 = vmax.f32 %v3355_v43, 0.0  ;;  %v3353_v32 = vadd.f32 %v3312_v13, %v3061_v29 }
 0x2e1   : > { %v3403_v27 = vpack.c.bf16 %v3387_v8, %v3386_v24  ;;  %v3385_v63 = vmax.f32 %v3353_v32, 0.0  ;;  %v3633_v32 = vunpack.c.h.bf16 %v4636_v40 }
 0x2e3   : > { %v3402_v16 = vpack.c.bf16 %v3385_v63, %v3384_v11 }
 0x2e5   : > { %4572 = vmatprep.mubr.msk.bf16.mxu0 %vm617_vm3, %v3402_v16 }
 0x2e6   : > { %4573 = vmatmul.mubr.msk.bf16.gmra.mxu0 %vm617_vm3, %v3403_v27 }
 0x36e   : > { %v4546_v47 = vpop.f32.mrf.mxu0 }
 0x36f   : > { %v3506_v10 = vadd.f32 %v4546_v47, %v5849_v23 }
 0x370   : > { %v3497_v12 = vpop.f32.mrf.mxu0 }
 0x371   : > { %v3658_v5 = vadd.f32 %v3626_v17, %v3506_v10  ;;  %v3498_v37 = vadd.f32 %v5849_v23, %v3497_v12  ;;  %v3638_v17 = vunpack.c.l.bf16 %v4637_v51  ;;  %v4638_v12 = vld [vmem:[%s4712_s30 + $0x30] sm:$0xff]  }
 0x372   : > { %v4547_v45 = vpop.f32.mrf.mxu0 }
 0x373   : > { %v3690_v7 = vmax.f32 %v3658_v5, 0.0  ;;  %v3656_v55 = vadd.f32 %v3624_v3, %v3498_v37  ;;  %v3509_v33 = vadd.f32 %v4547_v45, %v5849_v23  ;;  %v3636_v5 = vunpack.c.l.bf16 %v4638_v12 }
 0x374   : > { %v3500_v61 = vpop.f32.mrf.mxu0 }
 0x375   : > { %3722 = vst.msk [vmem:[%s5859_s13 + $0x10] sm:$0xff] %vm371_vm2, %v3690_v7  ;;  %v3688_v56 = vmax.f32 %v3656_v55, 0.0  ;;  %v3659_v30 = vadd.f32 %v3627_v54, %v3509_v33  ;;  %v3501_v39 = vadd.f32 %v5849_v23, %v3500_v61  ;;  %v3639_v7 = vunpack.c.h.bf16 %v4637_v51 }
 0x376   : > { %v4550_v42 = vpop.f32.mrf.mxu0 }
 0x377   : > { %3720 = vst.msk [vmem:[%s5859_s13] sm:$0xff] %vm371_vm2, %v3688_v56  ;;  %v3691_v58 = vmax.f32 %v3659_v30, 0.0  ;;  %v3657_v44 = vadd.f32 %v3625_v14, %v3501_v39  ;;  %v3522_v38 = vadd.f32 %v4550_v42, %v5849_v23  ;;  %v3637_v30 = vunpack.c.h.bf16 %v4638_v12 }
 0x378   : > { %v3513_v25 = vpop.f32.mrf.mxu0 }
 0x379   : > { %3723 = vst.msk [vmem:[%s5859_s13 + $0x18] sm:$0xff] %vm371_vm2, %v3691_v58  ;;  %v3689_v52 = vmax.f32 %v3657_v44, 0.0  ;;  %v3662_v60 = vadd.f32 %v3630_v22, %v3522_v38  ;;  %v3514_v53 = vadd.f32 %v5849_v23, %v3513_v25  ;;  %v4639_v58 = vld [vmem:[%s4712_s30 + $0x48] sm:$0xff]  }
 0x37a   : > { %v4551_v4 = vpop.f32.mrf.mxu0  ;;  %v3642_v44 = vunpack.c.l.bf16 %v4639_v58 }
 0x37b   : > { %3721 = vst.msk [vmem:[%s5859_s13 + $0x8] sm:$0xff] %vm371_vm2, %v3689_v52  ;;  %v3694_v50 = vmax.f32 %v3662_v60, 0.0  ;;  %v3660_v36 = vadd.f32 %v3628_v57, %v3514_v53  ;;  %v3525_v21 = vadd.f32 %v4551_v4, %v5849_v23  ;;  %v3640_v57 = vunpack.c.l.bf16 %v4640_v26 }
 0x37c   : > { %v3516_v0 = vpop.f32.mrf.mxu0 }
 0x37d   : > { %3726 = vst.msk [vmem:[%s5859_s13 + $0x30] sm:$0xff] %vm371_vm2, %v3694_v50  ;;  %v3692_v41 = vmax.f32 %v3660_v36, 0.0  ;;  %v3663_v2 = vadd.f32 %v3631_v35, %v3525_v21  ;;  %v3517_v18 = vadd.f32 %v5849_v23, %v3516_v0  ;;  %v3643_v36 = vunpack.c.h.bf16 %v4639_v58 }
 0x37e   : > { %v4554_v31 = vpop.f32.mrf.mxu0 }
 0x37f   : > { %3724 = vst.msk [vmem:[%s5859_s13 + $0x20] sm:$0xff] %vm371_vm2, %v3692_v41  ;;  %v3695_v62 = vmax.f32 %v3663_v2, 0.0  ;;  %v3661_v15 = vadd.f32 %v3629_v6, %v3517_v18  ;;  %v3538_v48 = vadd.f32 %v4554_v31, %v5849_v23  ;;  %v3641_v6 = vunpack.c.h.bf16 %v4640_v26  ;;  %v4645_v26 = vld [vmem:[%s4712_s30 + $0x78] sm:$0xff]  }
 0x380   : > { %v3529_v1 = vpop.f32.mrf.mxu0 }
 0x381   : > { %3727 = vst.msk [vmem:[%s5859_s13 + $0x38] sm:$0xff] %vm371_vm2, %v3695_v62  ;;  %v3693_v59 = vmax.f32 %v3661_v15, 0.0  ;;  %v3666_v28 = vadd.f32 %v3634_v49, %v3538_v48  ;;  %v3530_v29 = vadd.f32 %v5849_v23, %v3529_v1  ;;  %v4641_v62 = vld [vmem:[%s4712_s30 + $0x58] sm:$0xff]  }
 0x382   : > { %v4555_v43 = vpop.f32.mrf.mxu0  ;;  %v3646_v15 = vunpack.c.l.bf16 %v4641_v62 }
 0x383   : > { %3725 = vst.msk [vmem:[%s5859_s13 + $0x28] sm:$0xff] %vm371_vm2, %v3693_v59  ;;  %v3698_v13 = vmax.f32 %v3666_v28, 0.0  ;;  %v3664_v24 = vadd.f32 %v3632_v9, %v3530_v29  ;;  %v3541_v8 = vadd.f32 %v4555_v43, %v5849_v23  ;;  %v4642_v59 = vld [vmem:[%s4712_s30 + $0x50] sm:$0xff]  }
 0x384   : > { %v3532_v11 = vpop.f32.mrf.mxu0  ;;  %v3644_v28 = vunpack.c.l.bf16 %v4642_v59 }
 0x385   : > { %3730 = vst.msk [vmem:[%s5859_s13 + $0x50] sm:$0xff] %vm371_vm2, %v3698_v13  ;;  %v3696_v27 = vmax.f32 %v3664_v24, 0.0  ;;  %v3667_v63 = vadd.f32 %v3635_v34, %v3541_v8  ;;  %v3533_v16 = vadd.f32 %v5849_v23, %v3532_v11  ;;  %v3647_v24 = vunpack.c.h.bf16 %v4641_v62 }
 0x386   : > { %v4558_v47 = vpop.f32.mrf.mxu0 }
 0x387   : > { %3728 = vst.msk [vmem:[%s5859_s13 + $0x40] sm:$0xff] %vm371_vm2, %v3696_v27  ;;  %v3699_v46 = vmax.f32 %v3667_v63, 0.0  ;;  %v3665_v3 = vadd.f32 %v3633_v32, %v3533_v16  ;;  %v3554_v10 = vadd.f32 %v4558_v47, %v5849_v23  ;;  %v3645_v63 = vunpack.c.h.bf16 %v4642_v59 }
 0x388   : > { %v3545_v37 = vpop.f32.mrf.mxu0 }
 0x389   : > { %3731 = vst.msk [vmem:[%s5859_s13 + $0x58] sm:$0xff] %vm371_vm2, %v3699_v46  ;;  %v3697_v54 = vmax.f32 %v3665_v3, 0.0  ;;  %v3670_v45 = vadd.f32 %v3638_v17, %v3554_v10  ;;  %v3546_v14 = vadd.f32 %v5849_v23, %v3545_v37  ;;  %v4643_v46 = vld [vmem:[%s4712_s30 + $0x68] sm:$0xff]  }
 0x38a   : > { %v4559_v55 = vpop.f32.mrf.mxu0  ;;  %v3650_v3 = vunpack.c.l.bf16 %v4643_v46 }
 0x38b   : > { %3729 = vst.msk [vmem:[%s5859_s13 + $0x48] sm:$0xff] %vm371_vm2, %v3697_v54  ;;  %v3702_v33 = vmax.f32 %v3670_v45, 0.0  ;;  %v3668_v61 = vadd.f32 %v3636_v5, %v3546_v14  ;;  %v3557_v56 = vadd.f32 %v4559_v55, %v5849_v23  ;;  %v4644_v54 = vld [vmem:[%s4712_s30 + $0x60] sm:$0xff]  }
 0x38c   : > { %v3548_v39 = vpop.f32.mrf.mxu0  ;;  %v3648_v45 = vunpack.c.l.bf16 %v4644_v54 }
 0x38d   : > { %3734 = vst.msk [vmem:[%s5859_s13 + $0x70] sm:$0xff] %vm371_vm2, %v3702_v33  ;;  %v3700_v20 = vmax.f32 %v3668_v61, 0.0  ;;  %v3671_v22 = vadd.f32 %v3639_v7, %v3557_v56  ;;  %v3549_v42 = vadd.f32 %v5849_v23, %v3548_v39  ;;  %v3651_v61 = vunpack.c.h.bf16 %v4643_v46 }
 0x38e   : > { %v4562_v38 = vpop.f32.mrf.mxu0 }
 0x38f   : > { %3732 = vst.msk [vmem:[%s5859_s13 + $0x60] sm:$0xff] %vm371_vm2, %v3700_v20  ;;  %v3703_v25 = vmax.f32 %v3671_v22, 0.0  ;;  %v3669_v52 = vadd.f32 %v3637_v30, %v3549_v42  ;;  %v3570_v60 = vadd.f32 %v4562_v38, %v5849_v23  ;;  %v3649_v22 = vunpack.c.h.bf16 %v4644_v54 }
 0x390   : > { %v3561_v53 = vpop.f32.mrf.mxu0 }
 0x391   : > { %3735 = vst.msk [vmem:[%s5859_s13 + $0x78] sm:$0xff] %vm371_vm2, %v3703_v25  ;;  %v3701_v35 = vmax.f32 %v3669_v52, 0.0  ;;  %v3674_v4 = vadd.f32 %v3642_v44, %v3570_v60  ;;  %v3562_v50 = vadd.f32 %v5849_v23, %v3561_v53 }
 0x392   : > { %v4563_v21 = vpop.f32.mrf.mxu0 }
 0x393   : > { %3733 = vst.msk [vmem:[%s5859_s13 + $0x68] sm:$0xff] %vm371_vm2, %v3701_v35  ;;  %v3706_v0 = vmax.f32 %v3674_v4, 0.0  ;;  %v3672_v41 = vadd.f32 %v3640_v57, %v3562_v50  ;;  %v3573_v2 = vadd.f32 %v4563_v21, %v5849_v23  ;;  %v3654_v57 = vunpack.c.l.bf16 %v4645_v26  ;;  %v4646_v35 = vld [vmem:[%s4712_s30 + $0x70] sm:$0xff]  }
 0x394   : > { %v3564_v18 = vpop.f32.mrf.mxu0  ;;  %v3652_v4 = vunpack.c.l.bf16 %v4646_v35 }
 0x395   : > { %3738 = vst.msk [vmem:[%s5859_s13 + $0x90] sm:$0xff] %vm371_vm2, %v3706_v0  ;;  %v3704_v19 = vmax.f32 %v3672_v41, 0.0  ;;  %v3675_v49 = vadd.f32 %v3643_v36, %v3573_v2  ;;  %v3565_v31 = vadd.f32 %v5849_v23, %v3564_v18  ;;  %v3655_v0 = vunpack.c.h.bf16 %v4645_v26 }
 0x396   : > { %v4566_v48 = vpop.f32.mrf.mxu0 }
 0x397   : > { %3736 = vst.msk [vmem:[%s5859_s13 + $0x80] sm:$0xff] %vm371_vm2, %v3704_v19  ;;  %v3707_v40 = vmax.f32 %v3675_v49, 0.0  ;;  %v3673_v9 = vadd.f32 %v3641_v6, %v3565_v31  ;;  %v3586_v1 = vadd.f32 %v4566_v48, %v5849_v23  ;;  %v3653_v49 = vunpack.c.h.bf16 %v4646_v35 }
 0x398   : > { %v3577_v29 = vpop.f32.mrf.mxu0 }
 0x399   : > { %3739 = vst.msk [vmem:[%s5859_s13 + $0x98] sm:$0xff] %vm371_vm2, %v3707_v40  ;;  %v3705_v34 = vmax.f32 %v3673_v9, 0.0  ;;  %v3678_v43 = vadd.f32 %v3646_v15, %v3586_v1  ;;  %v3578_v13 = vadd.f32 %v5849_v23, %v3577_v29 }
 0x39a   : > { %v4567_v8 = vpop.f32.mrf.mxu0 }
 0x39b   : > { %3737 = vst.msk [vmem:[%s5859_s13 + $0x88] sm:$0xff] %vm371_vm2, %v3705_v34  ;;  %v3710_v32 = vmax.f32 %v3678_v43, 0.0  ;;  %v3676_v11 = vadd.f32 %v3644_v28, %v3578_v13  ;;  %v3589_v27 = vadd.f32 %v4567_v8, %v5849_v23 }
 0x39c   : > { %v3580_v16 = vpop.f32.mrf.mxu0 }
 0x39d   : > { %3742 = vst.msk [vmem:[%s5859_s13 + $0xb0] sm:$0xff] %vm371_vm2, %v3710_v32  ;;  %v3708_v51 = vmax.f32 %v3676_v11, 0.0  ;;  %v3679_v17 = vadd.f32 %v3647_v24, %v3589_v27  ;;  %v3581_v47 = vadd.f32 %v5849_v23, %v3580_v16 }
 0x39e   : > { %v4570_v10 = vpop.f32.mrf.mxu0 }
 0x39f   : > { %3740 = vst.msk [vmem:[%s5859_s13 + $0xa0] sm:$0xff] %vm371_vm2, %v3708_v51  ;;  %v3711_v12 = vmax.f32 %v3679_v17, 0.0  ;;  %v3677_v5 = vadd.f32 %v3645_v63, %v3581_v47  ;;  %v3602_v37 = vadd.f32 %v4570_v10, %v5849_v23 }
 0x3a0   : > { %v3593_v14 = vpop.f32.mrf.mxu0 }
 0x3a1   : > { %3743 = vst.msk [vmem:[%s5859_s13 + $0xb8] sm:$0xff] %vm371_vm2, %v3711_v12  ;;  %v3709_v7 = vmax.f32 %v3677_v5, 0.0  ;;  %v3682_v55 = vadd.f32 %v3650_v3, %v3602_v37  ;;  %v3594_v33 = vadd.f32 %v5849_v23, %v3593_v14 }
 0x3a2   : > { %v4571_v56 = vpop.f32.mrf.mxu0 }
 0x3a3   : > { %3741 = vst.msk [vmem:[%s5859_s13 + $0xa8] sm:$0xff] %vm371_vm2, %v3709_v7  ;;  %v3714_v30 = vmax.f32 %v3682_v55, 0.0  ;;  %v3680_v39 = vadd.f32 %v3648_v45, %v3594_v33  ;;  %v3605_v20 = vadd.f32 %v4571_v56, %v5849_v23 }
 0x3a4   : > { %v3596_v42 = vpop.f32.mrf.mxu0 }
 0x3a5   : > { %3746 = vst.msk [vmem:[%s5859_s13 + $0xd0] sm:$0xff] %vm371_vm2, %v3714_v30  ;;  %v3712_v58 = vmax.f32 %v3680_v39, 0.0  ;;  %v3683_v44 = vadd.f32 %v3651_v61, %v3605_v20  ;;  %v3597_v38 = vadd.f32 %v5849_v23, %v3596_v42 }
 0x3a6   : > { %v4574_v25 = vpop.f32.mrf.mxu0 }
 0x3a7   : > { %3744 = vst.msk [vmem:[%s5859_s13 + $0xc0] sm:$0xff] %vm371_vm2, %v3712_v58  ;;  %v3715_v52 = vmax.f32 %v3683_v44, 0.0  ;;  %v3681_v60 = vadd.f32 %v3649_v22, %v3597_v38  ;;  %v3618_v53 = vadd.f32 %v4574_v25, %v5849_v23 }
 0x3a8   : > { %v3609_v50 = vpop.f32.mrf.mxu0 }
 0x3a9   : > { %3747 = vst.msk [vmem:[%s5859_s13 + $0xd8] sm:$0xff] %vm371_vm2, %v3715_v52  ;;  %v3713_v36 = vmax.f32 %v3681_v60, 0.0  ;;  %v3686_v21 = vadd.f32 %v3654_v57, %v3618_v53  ;;  %v3610_v6 = vadd.f32 %v5849_v23, %v3609_v50 }
 0x3aa   : > { %v4575_v41 = vpop.f32.mrf.mxu0 }
 0x3ab   : > { %3745 = vst.msk [vmem:[%s5859_s13 + $0xc8] sm:$0xff] %vm371_vm2, %v3713_v36  ;;  %v3718_v2 = vmax.f32 %v3686_v21, 0.0  ;;  %v3684_v18 = vadd.f32 %v3652_v4, %v3610_v6  ;;  %v3621_v19 = vadd.f32 %v4575_v41, %v5849_v23 }
 0x3ac   : > { %v3612_v31 = vpop.f32.mrf.mxu0 }
 0x3ad   : > { %3750 = vst.msk [vmem:[%s5859_s13 + $0xf0] sm:$0xff] %vm371_vm2, %v3718_v2  ;;  %v3716_v62 = vmax.f32 %v3684_v18, 0.0  ;;  %v3687_v15 = vadd.f32 %v3655_v0, %v3621_v19  ;;  %v3613_v48 = vadd.f32 %v5849_v23, %v3612_v31 }
 0x3af   : > { %3748 = vst.msk [vmem:[%s5859_s13 + $0xe0] sm:$0xff] %vm371_vm2, %v3716_v62  ;;  %v3719_v40 = vmax.f32 %v3687_v15, 0.0  ;;  %v3685_v9 = vadd.f32 %v3653_v49, %v3613_v48 }
 0x3b1   : > { %3751 = vst.msk [vmem:[%s5859_s13 + $0xf8] sm:$0xff] %vm371_vm2, %v3719_v40  ;;  %v3717_v1 = vmax.f32 %v3685_v9, 0.0 }
 0x3b3   : > { %3749 = vst.msk [vmem:[%s5859_s13 + $0xe8] sm:$0xff] %vm371_vm2, %v3717_v1 }
 0x3b4 PF: > { %s16_s21 = sadd.s32 1, %s4653_s21  }
 0x3b5   : > { %p13_p4 = scmp.ge.s32.totalorder %s16_s21, 4  }
 0x3b7   :  { %15 = sbr.rel (!%p13_p4) target bundleno = 1 (0x1), region = 76 }

</bundles_post_ra>
